<compile_context>
chip_gen: v6e
topology: v6e:2x2x1
jax: 0.10.0
libtpu: 0.0.40
codegen_flags: <defaults>
</compile_context>

<pallas_src>
import jax
import jax.numpy as jnp
import numpy as np
from jax.experimental import pallas as pl
from jax.experimental.pallas import tpu as pltpu

_LANE_GROUP = 256      # MXU contraction depth (matches v6e/v7x 256x256 MXU)


def voxel_loss_head_forward(batch_dict):
    """VoxelLossHead.forward is an identity pass-through of batch_dict."""
    return batch_dict


def _voxel_loss_kernel(cnt_ref,                               # scalar prefetch: (N,) i32 in SMEM
                       pred_ref, idx_ref, tgt_ref, wgt_ref,   # inputs
                       out_ref,                               # (1,1,128) f32
                       x_acc_ref, onehot_ref, rowbase_ref):   # VMEM scratch
    i = pl.program_id(0)            # batch sample
    c = pl.program_id(1)            # voxel chunk
    n_chunks = pl.num_programs(1)
    cnt = cnt_ref[i]                # true ray-voxel count for this sample

    rc2 = pred_ref.shape[1]         # rows of 256 lanes in this chunk
    k = idx_ref.shape[2]            # padded ray-voxel capacity

    @pl.when(c == 0)
    def _():
        x_acc_ref[...] = jnp.zeros_like(x_acc_ref)

    # ---- chunk-invariant prep, once per sample -----------------------------
    @pl.when(jnp.logical_and(cnt > 0, c == 0))
    def _():
        idxv = idx_ref[0]                                     # (1, k) i32
        lane = jnp.bitwise_and(idxv, _LANE_GROUP - 1)         # idx % 256
        l_iota = jax.lax.broadcasted_iota(jnp.int32, (_LANE_GROUP, k), 0)
        onehot_ref[...] = (l_iota == lane).astype(jnp.float32)  # (256, k)
        rowbase_ref[...] = jnp.right_shift(idxv, 8)           # idx // 256

    # ---- per-chunk gather ---------------------------------------------------
    @pl.when(cnt > 0)               # empty-ray samples skip the gather
    def _():
        pred = pred_ref[0]                                    # (rc2, 256) f32
        # Stage 1 (MXU): cand[r, j] = pred[r, idx[j] % 256]; HIGHEST precision
        # keeps the f32 selection exact (one-hot is exact in any split).
        cand = jnp.dot(pred, onehot_ref[...],
                       preferred_element_type=jnp.float32,
                       precision=jax.lax.Precision.HIGHEST)   # (rc2, k)
        # Stage 2 (VPU select + XLU sublane-sum): pick the chunk-local row.
        # Indices whose row lies outside this chunk select nothing, so the
        # accumulation over chunks is exact.
        row = rowbase_ref[...] - c * rc2                      # (1, k)
        r_iota = jax.lax.broadcasted_iota(jnp.int32, (rc2, k), 0)
        x_acc_ref[...] += jnp.sum(jnp.where(r_iota == row, cand, 0.0),
                                  axis=0, keepdims=True)

    # ---- finalize: BCE + normalized per-sample reduction --------------------
    @pl.when(c == n_chunks - 1)
    def _():
        x = x_acc_ref[...]          # (1, k) gathered logits
        y = tgt_ref[0]              # (1, k) occupancy targets
        w = wgt_ref[0]              # (1, k) (norm_dist or 1) * validity mask
        # F.binary_cross_entropy_with_logits(..., reduction='none'), stable form
        bce = jnp.maximum(x, 0.0) - x * y + jnp.log1p(jnp.exp(-jnp.abs(x)))
        num = jnp.sum(bce * w)
        den = jnp.sum(y * w)
        # parity with torch: den == 0 while cnt > 0 still yields inf.
        safe_den = jnp.where(cnt > 0, den, 1.0)
        contrib = jnp.where(cnt > 0, num / safe_den, 0.0)
        out_ref[...] = jnp.full(out_ref.shape, contrib, dtype=out_ref.dtype)


def voxel_loss_pallas(pred_flat, idx, tgt, wgt, counts, *, loss_weight,
                      rows256_per_chunk=4096):
    """
    pred_flat: (N, V)    f32 — per-sample row-major flattened voxel logits.
    idx      : (N, 1, K) i32 — voxels_in_ray, padded (padding clamped to 0).
    tgt      : (N, 1, K) f32 — occupancy_of_voxels_in_ray (padded).
    wgt      : (N, 1, K) f32 — (norm_dist if POS_WEIGHT else 1) * valid-mask.
    counts   : (N,)      i32 — true number of ray voxels per sample.
    rows256_per_chunk: pred chunk height in 256-lane rows (4096 ~= 4 MiB/buffer).
    """
    N, V = pred_flat.shape
    K0 = idx.shape[2]

    # Pad the ray axis to a multiple of the lane group (padded slots have zero
    # weight, so they contribute nothing to num/den).
    K = ((K0 + _LANE_GROUP - 1) // _LANE_GROUP) * _LANE_GROUP
    if K != K0:
        pad = ((0, 0), (0, 0), (0, K - K0))
        idx = jnp.pad(idx, pad)
        tgt = jnp.pad(tgt, pad)
        wgt = jnp.pad(wgt, pad)

    # 256-wide lane groups, chunked along the voxel axis.
    R2 = pl.cdiv(V, _LANE_GROUP)
    rc2 = int(max(8, min(int(rows256_per_chunk), 8192, R2)))  # <= 8 MiB/buffer (v7x-safe)
    rc2 = ((rc2 + 7) // 8) * 8                                # multiple of 8 sublanes
    R2_pad = ((R2 + rc2 - 1) // rc2) * rc2
    V_pad = R2_pad * _LANE_GROUP
    if V_pad != V:
        pred_flat = jnp.pad(pred_flat, ((0, 0), (0, V_pad - V)))
    pred = pred_flat.reshape(N, R2_pad, _LANE_GROUP)
    n_chunks = R2_pad // rc2

    out = pl.pallas_call(
        _voxel_loss_kernel,
        out_shape=jax.ShapeDtypeStruct((N, 1, 128), jnp.float32),
        grid_spec=pltpu.PrefetchScalarGridSpec(
            num_scalar_prefetch=1,
            grid=(N, n_chunks),
            in_specs=[
                pl.BlockSpec((1, rc2, _LANE_GROUP), lambda i, c, cnt: (i, c, 0)),  # pred chunk
                pl.BlockSpec((1, 1, K), lambda i, c, cnt: (i, 0, 0)),              # idx
                pl.BlockSpec((1, 1, K), lambda i, c, cnt: (i, 0, 0)),              # targets
                pl.BlockSpec((1, 1, K), lambda i, c, cnt: (i, 0, 0)),              # weights*mask
            ],
            out_specs=pl.BlockSpec((1, 1, 128), lambda i, c, cnt: (i, 0, 0)),
            scratch_shapes=[
                pltpu.VMEM((1, K), jnp.float32),             # gathered-logit accumulator
                pltpu.VMEM((_LANE_GROUP, K), jnp.float32),   # hoisted lane one-hot
                pltpu.VMEM((1, K), jnp.int32),               # hoisted idx >> 8 row base
            ],
        ),
        compiler_params=pltpu.CompilerParams(
            dimension_semantics=("parallel", "arbitrary"),
            vmem_limit_bytes=32 * 1024 * 1024,
        ),
    )(counts, pred, idx, tgt, wgt)

    per_sample = out[:, 0, 0]                     # (N,) per-sample loss terms
    return jnp.sum(per_sample) * (loss_weight / N)


def _reference_loss(pred_flat, idx, tgt, wgt, counts, loss_weight):
    """Pure-numpy replica of VoxelLossHead.get_loss (bce_loss, POS_WEIGHT)."""
    pred_flat = np.asarray(pred_flat, np.float64)
    idx = np.asarray(idx)
    tgt = np.asarray(tgt, np.float64)
    wgt = np.asarray(wgt, np.float64)
    counts = np.asarray(counts)
    N = pred_flat.shape[0]
    total = 0.0
    for i in range(N):
        k = int(counts[i])
        if k == 0:
            continue  # pred.sum() * 0.0
        ii = idx[i, 0, :k]
        x = pred_flat[i][ii]
        y = tgt[i, 0, :k]
        w = wgt[i, 0, :k]
        bce = np.maximum(x, 0.0) - x * y + np.log1p(np.exp(-np.abs(x)))
        total += (bce * w).sum() / (y * w).sum() / N
    return total * loss_weight


if __name__ == "__main__":
    # model_cfg: LOSS_TYPE='bce_loss', WEIGHTS=2.0, POS_WEIGHT=True
    # point_cloud_range only supplies min/max depth (unused by the loss math).
    LOSS_WEIGHT = 2.0
    POS_WEIGHT = True

    N, D, H, W = 3, 16, 16, 16
    V = D * H * W            # 4096 flattened voxels per sample
    K = 200                  # padded max ray-voxels per sample (exercises K padding)
    counts_np = np.array([180, 0, 130], dtype=np.int32)   # sample 1: empty ray list

    key = jax.random.PRNGKey(0)
    k1, k2, k3, k4 = jax.random.split(key, 4)

    # batch_dict['voxel_occupancy'] : (N, 1, D, H, W) logits
    voxel_occupancy = jax.random.normal(k1, (N, 1, D, H, W), jnp.float32)
    idx = jax.random.randint(k2, (N, 1, K), 0, V, jnp.int32)            # voxels_in_ray (padded)
    tgt = jax.random.bernoulli(k3, 0.5, (N, 1, K)).astype(jnp.float32)  # occupancy targets
    norm_dist = jax.random.uniform(k4, (N, 1, K), jnp.float32, 0.1, 1.0)

    mask = (jnp.arange(K)[None, None, :] < counts_np[:, None, None]).astype(jnp.float32)
    idx = jnp.where(mask > 0, idx, 0)             # clamp padded indices to 0
    base_w = norm_dist if POS_WEIGHT else jnp.ones_like(norm_dist)
    wgt = base_w * mask                           # zero weight on padded slots
    counts = jnp.asarray(counts_np)

    # glue: .squeeze(1) + per-sample .view(-1)  ->  (N, V) row-major
    pred_flat = voxel_occupancy.reshape(N, V)

    # Default (large) chunk: single V-chunk per sample at this size.
    loss = voxel_loss_pallas(pred_flat, idx, tgt, wgt, counts,
                             loss_weight=LOSS_WEIGHT)
    # Small chunk to exercise the V-chunked accumulation path (2 chunks).
    loss_chunked = voxel_loss_pallas(pred_flat, idx, tgt, wgt, counts,
                                     loss_weight=LOSS_WEIGHT,
                                     rows256_per_chunk=8)
    loss, loss_chunked = jax.block_until_ready((loss, loss_chunked))

    ref = _reference_loss(pred_flat, idx, tgt, base_w, counts, LOSS_WEIGHT)
    np.testing.assert_allclose(float(loss), ref, rtol=5e-5, atol=1e-6)
    np.testing.assert_allclose(float(loss_chunked), ref, rtol=5e-5, atol=1e-6)
    print("KERNEL_OK")
</pallas_src>

<mosaic_0001>
module attributes {stable_mosaic.version = 11 : i64} {
  func.func @_voxel_loss_kernel(%arg0: i32, %arg1: i32, %arg2: memref<3xi32, #tpu.memory_space<smem>>, %arg3: memref<1x16x256xf32, #tpu.memory_space<vmem>>, %arg4: memref<1x1x256xi32, #tpu.memory_space<vmem>>, %arg5: memref<1x1x256xf32, #tpu.memory_space<vmem>>, %arg6: memref<1x1x256xf32, #tpu.memory_space<vmem>>, %arg7: memref<1x1x128xf32, #tpu.memory_space<vmem>>, %arg8: memref<1x256xf32, #tpu.memory_space<vmem>>, %arg9: memref<256x256xf32, #tpu.memory_space<vmem>>, %arg10: memref<1x256xi32, #tpu.memory_space<vmem>>) attributes {dimension_semantics = [#tpu.dimension_semantics<parallel>, #tpu.dimension_semantics<arbitrary>], iteration_bounds = array<i64: 3, 1>, scalar_prefetch = 1 : i64, scratch_operands = 3 : i64, tpu.core_type = #tpu.core_type<tc>, window_params = [{transform_indices = @transform_0, window_bounds = array<i64: 1, 16, 256>}, {transform_indices = @transform_1, window_bounds = array<i64: 1, 1, 256>}, {transform_indices = @transform_2, window_bounds = array<i64: 1, 1, 256>}, {transform_indices = @transform_3, window_bounds = array<i64: 1, 1, 256>}, {transform_indices = @transform_4, window_bounds = array<i64: 1, 1, 128>}]} {
    %0 = arith.index_cast %arg0 : i32 to index
    %1 = memref.load %arg2[%0] : memref<3xi32, #tpu.memory_space<smem>>
    %c0_i32 = arith.constant 0 : i32
    %2 = arith.cmpi eq, %arg1, %c0_i32 : i32
    %3 = arith.extui %2 : i1 to i32
    %c0_i32_0 = arith.constant 0 : i32
    %4 = arith.cmpi ne, %3, %c0_i32_0 : i32
    scf.if %4 {
      %cst = arith.constant 0.000000e+00 : f32
      %16 = vector.broadcast %cst : f32 to vector<1x256xf32>
      %c0 = arith.constant 0 : index
      %c0_8 = arith.constant 0 : index
      %17 = vector.load %arg8[%c0, %c0_8] : memref<1x256xf32, #tpu.memory_space<vmem>>, vector<1x256xf32>
      tpu.vector_store %arg8[%c0, %c0_8], %16 {strides = array<i32>} : memref<1x256xf32, #tpu.memory_space<vmem>>, vector<1x256xf32>,
    } else {
    }
    %c0_i32_1 = arith.constant 0 : i32
    %5 = arith.cmpi sgt, %1, %c0_i32_1 : i32
    %c0_i32_2 = arith.constant 0 : i32
    %6 = arith.cmpi eq, %arg1, %c0_i32_2 : i32
    %7 = arith.andi %5, %6 : i1
    %8 = arith.extui %7 : i1 to i32
    %c0_i32_3 = arith.constant 0 : i32
    %9 = arith.cmpi ne, %8, %c0_i32_3 : i32
    scf.if %9 {
      %c0 = arith.constant 0 : index
      %c0_8 = arith.constant 0 : index
      %c0_9 = arith.constant 0 : index
      %16 = vector.load %arg4[%c0, %c0_8, %c0_9] : memref<1x1x256xi32, #tpu.memory_space<vmem>>, vector<1x1x256xi32>
      %17 = vector.shape_cast %16 : vector<1x1x256xi32> to vector<1x256xi32>
      %c255_i32 = arith.constant 255 : i32
      %18 = vector.broadcast %c255_i32 : i32 to vector<1x256xi32>
      %19 = arith.andi %17, %18 : vector<1x256xi32>
      %20 = tpu.iota {dimensions = array<i32: 0>} : vector<256x256xi32>
      %21 = vector.broadcast %19 : vector<1x256xi32> to vector<256x256xi32>
      %22 = arith.cmpi eq, %20, %21 : vector<256x256xi32>
      %23 = arith.extui %22 : vector<256x256xi1> to vector<256x256xi32>
      %24 = arith.sitofp %23 : vector<256x256xi32> to vector<256x256xf32>
      %c0_10 = arith.constant 0 : index
      %c0_11 = arith.constant 0 : index
      %25 = vector.load %arg9[%c0_10, %c0_11] : memref<256x256xf32, #tpu.memory_space<vmem>>, vector<256x256xf32>
      tpu.vector_store %arg9[%c0_10, %c0_11], %24 {strides = array<i32>} : memref<256x256xf32, #tpu.memory_space<vmem>>, vector<256x256xf32>,
      %c8_i32 = arith.constant 8 : i32
      %26 = vector.broadcast %c8_i32 : i32 to vector<1x256xi32>
      %27 = arith.shrsi %17, %26 : vector<1x256xi32>
      %c0_12 = arith.constant 0 : index
      %c0_13 = arith.constant 0 : index
      %28 = vector.load %arg10[%c0_12, %c0_13] : memref<1x256xi32, #tpu.memory_space<vmem>>, vector<1x256xi32>
      tpu.vector_store %arg10[%c0_12, %c0_13], %27 {strides = array<i32>} : memref<1x256xi32, #tpu.memory_space<vmem>>, vector<1x256xi32>,
    } else {
    }
    %c0_i32_4 = arith.constant 0 : i32
    %10 = arith.cmpi sgt, %1, %c0_i32_4 : i32
    %11 = arith.extui %10 : i1 to i32
    %c0_i32_5 = arith.constant 0 : i32
    %12 = arith.cmpi ne, %11, %c0_i32_5 : i32
    scf.if %12 {
      %c0 = arith.constant 0 : index
      %c0_8 = arith.constant 0 : index
      %c0_9 = arith.constant 0 : index
      %16 = vector.load %arg3[%c0, %c0_8, %c0_9] : memref<1x16x256xf32, #tpu.memory_space<vmem>>, vector<1x16x256xf32>
      %17 = vector.shape_cast %16 : vector<1x16x256xf32> to vector<16x256xf32>
      %c0_10 = arith.constant 0 : index
      %c0_11 = arith.constant 0 : index
      %18 = vector.load %arg9[%c0_10, %c0_11] : memref<256x256xf32, #tpu.memory_space<vmem>>, vector<256x256xf32>
      %cst = arith.constant dense<0.000000e+00> : vector<16x256xf32>
      %19 = tpu.matmul %17, %18, %cst {dimension_numbers = #tpu.dot_dimension_numbers<[1], [0], [0], [1], [0, 0, 1, 1], [], []>, precision = #tpu.contract_precision<fp32>} : vector<16x256xf32>, vector<256x256xf32>, vector<16x256xf32> -> vector<16x256xf32>
      %c0_12 = arith.constant 0 : index
      %c0_13 = arith.constant 0 : index
      %20 = vector.load %arg10[%c0_12, %c0_13] : memref<1x256xi32, #tpu.memory_space<vmem>>, vector<1x256xi32>
      %c16_i32 = arith.constant 16 : i32
      %21 = arith.muli %arg1, %c16_i32 : i32
      %22 = vector.broadcast %21 : i32 to vector<1x256xi32>
      %23 = arith.subi %20, %22 : vector<1x256xi32>
      %24 = tpu.iota {dimensions = array<i32: 0>} : vector<16x256xi32>
      %c0_14 = arith.constant 0 : index
      %c0_15 = arith.constant 0 : index
      %25 = vector.load %arg8[%c0_14, %c0_15] : memref<1x256xf32, #tpu.memory_space<vmem>>, vector<1x256xf32>
      %26 = vector.broadcast %23 : vector<1x256xi32> to vector<16x256xi32>
      %27 = arith.cmpi eq, %24, %26 : vector<16x256xi32>
      %cst_16 = arith.constant 0.000000e+00 : f32
      %28 = vector.broadcast %cst_16 : f32 to vector<16x256xf32>
      %29 = arith.select %27, %19, %28 : vector<16x256xi1>, vector<16x256xf32>
      %cst_17 = arith.constant dense<0.000000e+00> : vector<256xf32>
      %30 = vector.multi_reduction <add>, %29, %cst_17 [0] : vector<16x256xf32> to vector<256xf32>
      %31 = vector.shape_cast %30 : vector<256xf32> to vector<1x256xf32>
      %32 = arith.addf %25, %31 : vector<1x256xf32>
      %c0_18 = arith.constant 0 : index
      %c0_19 = arith.constant 0 : index
      %33 = vector.load %arg8[%c0_18, %c0_19] : memref<1x256xf32, #tpu.memory_space<vmem>>, vector<1x256xf32>
      tpu.vector_store %arg8[%c0_18, %c0_19], %32 {strides = array<i32>} : memref<1x256xf32, #tpu.memory_space<vmem>>, vector<1x256xf32>,
    } else {
    }
    %c0_i32_6 = arith.constant 0 : i32
    %13 = arith.cmpi eq, %arg1, %c0_i32_6 : i32
    %14 = arith.extui %13 : i1 to i32
    %c0_i32_7 = arith.constant 0 : i32
    %15 = arith.cmpi ne, %14, %c0_i32_7 : i32
    scf.if %15 {
      %c0 = arith.constant 0 : index
      %c0_8 = arith.constant 0 : index
      %16 = vector.load %arg8[%c0, %c0_8] : memref<1x256xf32, #tpu.memory_space<vmem>>, vector<1x256xf32>
      %c0_9 = arith.constant 0 : index
      %c0_10 = arith.constant 0 : index
      %c0_11 = arith.constant 0 : index
      %17 = vector.load %arg5[%c0_9, %c0_10, %c0_11] : memref<1x1x256xf32, #tpu.memory_space<vmem>>, vector<1x1x256xf32>
      %18 = vector.shape_cast %17 : vector<1x1x256xf32> to vector<1x256xf32>
      %c0_12 = arith.constant 0 : index
      %c0_13 = arith.constant 0 : index
      %c0_14 = arith.constant 0 : index
      %19 = vector.load %arg6[%c0_12, %c0_13, %c0_14] : memref<1x1x256xf32, #tpu.memory_space<vmem>>, vector<1x1x256xf32>
      %20 = vector.shape_cast %19 : vector<1x1x256xf32> to vector<1x256xf32>
      %cst = arith.constant 0.000000e+00 : f32
      %21 = vector.broadcast %cst : f32 to vector<1x256xf32>
      %22 = arith.maximumf %16, %21 : vector<1x256xf32>
      %23 = arith.mulf %16, %18 : vector<1x256xf32>
      %24 = arith.subf %22, %23 : vector<1x256xf32>
      %25 = math.absf %16 : vector<1x256xf32>
      %cst_15 = arith.constant 0.000000e+00 : f32
      %26 = vector.broadcast %cst_15 : f32 to vector<1x256xf32>
      %27 = arith.subf %26, %25 : vector<1x256xf32>
      %28 = math.exp %27 : vector<1x256xf32>
      %29 = math.log1p %28 : vector<1x256xf32>
      %30 = arith.addf %24, %29 : vector<1x256xf32>
      %31 = arith.mulf %30, %20 : vector<1x256xf32>
      %32 = vector.shape_cast %31 : vector<1x256xf32> to vector<1x1x256xf32>
      %cst_16 = arith.constant dense<0.000000e+00> : vector<1xf32>
      %33 = vector.multi_reduction <add>, %32, %cst_16 [1, 2] : vector<1x1x256xf32> to vector<1xf32>
      %34 = vector.shape_cast %33 : vector<1xf32> to vector<1x1x1xf32>
      %35 = vector.extract %34[0, 0, 0] : f32 from vector<1x1x1xf32>
      %36 = arith.mulf %18, %20 : vector<1x256xf32>
      %37 = vector.shape_cast %36 : vector<1x256xf32> to vector<1x1x256xf32>
      %cst_17 = arith.constant dense<0.000000e+00> : vector<1xf32>
      %38 = vector.multi_reduction <add>, %37, %cst_17 [1, 2] : vector<1x1x256xf32> to vector<1xf32>
      %39 = vector.shape_cast %38 : vector<1xf32> to vector<1x1x1xf32>
      %40 = vector.extract %39[0, 0, 0] : f32 from vector<1x1x1xf32>
      %c0_i32_18 = arith.constant 0 : i32
      %41 = arith.cmpi sgt, %1, %c0_i32_18 : i32
      %cst_19 = arith.constant 1.000000e+00 : f32
      %42 = arith.select %41, %40, %cst_19 : f32
      %c0_i32_20 = arith.constant 0 : i32
      %43 = arith.cmpi sgt, %1, %c0_i32_20 : i32
      %44 = arith.divf %35, %42 : f32
      %cst_21 = arith.constant 0.000000e+00 : f32
      %45 = arith.select %43, %44, %cst_21 : f32
      %46 = vector.broadcast %45 : f32 to vector<1x1x128xf32>
      %c0_22 = arith.constant 0 : index
      %c0_23 = arith.constant 0 : index
      %c0_24 = arith.constant 0 : index
      %47 = vector.load %arg7[%c0_22, %c0_23, %c0_24] : memref<1x1x128xf32, #tpu.memory_space<vmem>>, vector<1x1x128xf32>
      tpu.vector_store %arg7[%c0_22, %c0_23, %c0_24], %46 {strides = array<i32>} : memref<1x1x128xf32, #tpu.memory_space<vmem>>, vector<1x1x128xf32>,
    } else {
    }
    return
  }
  func.func @transform_0(%arg0: i32, %arg1: i32, %arg2: memref<3xi32, #tpu.memory_space<smem>>) -> (i32, i32, i32) {
    %c0_i32 = arith.constant 0 : i32
    %c0_i32_0 = arith.constant 0 : i32
    return %arg0, %arg1, %c0_i32 : i32, i32, i32
  }
  func.func @transform_1(%arg0: i32, %arg1: i32, %arg2: memref<3xi32, #tpu.memory_space<smem>>) -> (i32, i32, i32) {
    %c0_i32 = arith.constant 0 : i32
    %c0_i32_0 = arith.constant 0 : i32
    %c0_i32_1 = arith.constant 0 : i32
    return %arg0, %c0_i32, %c0_i32_0 : i32, i32, i32
  }
  func.func @transform_2(%arg0: i32, %arg1: i32, %arg2: memref<3xi32, #tpu.memory_space<smem>>) -> (i32, i32, i32) {
    %c0_i32 = arith.constant 0 : i32
    %c0_i32_0 = arith.constant 0 : i32
    %c0_i32_1 = arith.constant 0 : i32
    return %arg0, %c0_i32, %c0_i32_0 : i32, i32, i32
  }
  func.func @transform_3(%arg0: i32, %arg1: i32, %arg2: memref<3xi32, #tpu.memory_space<smem>>) -> (i32, i32, i32) {
    %c0_i32 = arith.constant 0 : i32
    %c0_i32_0 = arith.constant 0 : i32
    %c0_i32_1 = arith.constant 0 : i32
    return %arg0, %c0_i32, %c0_i32_0 : i32, i32, i32
  }
  func.func @transform_4(%arg0: i32, %arg1: i32, %arg2: memref<3xi32, #tpu.memory_space<smem>>) -> (i32, i32, i32) {
    %c0_i32 = arith.constant 0 : i32
    %c0_i32_0 = arith.constant 0 : i32
    %c0_i32_1 = arith.constant 0 : i32
    return %arg0, %c0_i32, %c0_i32_0 : i32, i32, i32
  }
}

</mosaic_0001>

<bundles_post_ra>
// kernel: tpu_custom_call.1
= control target key start
LH: loop header
LB: loop body
LE: loop exit
PB: predicated region body
PF: predicated region fallthrough
CT: control target
= control target key end

     0   :  { %s2713_s18 = smov [#allocation6]   ;;  %s4411_s0 = inlined_call_operand.hbm [shape: s32[3], index: 0, kind: input, shape index: {}]   ;;  %s4412_s1 = inlined_call_operand.hbm [shape: f32[3,16,256], index: 1, kind: input, shape index: {}]   ;;  %s4413_s2 = inlined_call_operand.hbm [shape: s32[3,1,256], index: 2, kind: input, shape index: {}]   ;;  %s4414_s3 = inlined_call_operand.hbm [shape: f32[3,1,256], index: 3, kind: input, shape index: {}]   ;;  %s4415_s4 = inlined_call_operand.vmem [shape: f32[3,1,256], index: 4, kind: input, shape index: {}]   ;;  %s4416_s5 = inlined_call_operand.hbm [shape: f32[3,1,128], index: 5, kind: output, shape index: {}]  }
   0x1   :  { %4633 = sst [smem:[#allocation111_spill]] %s4412_s1 }
   0x2   :  { %4634 = sst [smem:[#allocation112_spill]] %s4413_s2 }
   0x3   :  { %4635 = sst [smem:[#allocation113_spill]] %s4414_s3 }
   0x4   :  { %11 = dma.hbm_to_smem %s4411_s0, 16, %s2713_s18, [#allocation5] }
   0x5   :  { %2675 = dma.done.wait [#allocation5], 16 }
   0x6   :  { %2676 = vsyncadd [#allocation5], 4294967280 }
   0x7   :  { %13 = sfence }
   0x8   :  { %14 = vsyncpa [#allocation8], 0 }
   0x9   :  { %16 = vsyncpa [#allocation8 + $0x1], 0 }
   0xa   :  { %17 = vsyncpa [#allocation11], 0 }
   0xb   :  { %19 = vsyncpa [#allocation11 + $0x1], 0 }
   0xc   :  { %20 = vsyncpa [#allocation9], 0 }
   0xd   :  { %22 = vsyncpa [#allocation9 + $0x1], 0  ;;  %s2756_s21 = smov 0   ;;  %s2758_s22 = smov 0  }
   0xe   :  { %s2760_s23 = smov 0   ;;  %s2762_s24 = smov 0  }
   0xf   :  { %s2764_s25 = smov 0   ;;  %s2766_s0 = smov 0  }
  0x10 LB: > { %s2787_s26 = sadd.s32 4294967295, %s2711_s0   ;;  %s2353_s27 = sadd.s32 4294967294, %s2711_s0   ;;  %s2711_s0 = sphi %s2766_s0, %s28_s0   ;;  %s2707_s25 = sphi %s2764_s25, %s5008_s25   ;;  %s2703_s24 = sphi %s2762_s24, %s5007_s24   ;;  %s2699_s23 = sphi %s2760_s23, %s5006_s23   ;;  %s2695_s22 = sphi %s2758_s22, %s5005_s22   ;;  %s2691_s21 = sphi %s2756_s21, %s5004_s21  }
  0x11   : > { %s40_s28 = sadd.s32 1, %s2707_s25  ;;  %s49_s29 = sadd.s32 1, %s2699_s23 }
  0x12   : > { %p42_p0 = scmp.ge.s32.totalorder %s40_s28, 3  ;;  %p56_p1 = scmp.ne.s32.totalorder %s2699_s23, %s2695_s22 }
  0x13   : > { %p57_p2 = scmp.eq.s32.totalorder %s2711_s0, 0  ;;  %p62_p3 = scmp.ne.s32.totalorder %s2695_s22, %s2691_s21 }
  0x14   : > { %s5010_s28 = smov (%p42_p0, %s40_s28), 0  ;;  %p63_p5 = scmp.eq.s32.totalorder %s2787_s26, 0 }
  0x15   : > { %4636 = sst [smem:[#allocation18_spill]] %s5010_s28  ;;  %p2799_p4 = por %p57_p2, %p56_p1 }
  0x16   : > { %s44_s6 = ssub.s32 %s2707_s25, %s5010_s28  ;;  %p164_p6 = scmp.eq.s32.totalorder %s2787_s26, 2 }
  0x17   : > { %p47_p7 = scmp.eq.s32.totalorder %s44_s6, 0  ;;  %p2807_p8 = por %p63_p5, %p62_p3 }
  0x18   : > { %p2811_p9 = por %p164_p6, %p56_p1  ;;  %p170_p10 = scmp.eq.s32.totalorder %s2353_s27, 2 }
  0x19   : > { %s2816_s9 = scalar_select %p47_p7, %s2699_s23, %s49_s29  }
  0x1a   : > { %p2818_p11 = por %p170_p10, %p62_p3  ;;  %p2471_p12 = scmp.lt.s32.totalorder %s2711_s0, 3 }
  0x1b   : > { %s2824_s11 = sand.u32 1, %s2699_s23   ;;  %s214_s12 = sand.u32 1, %s2711_s0  }
  0x1c   : > { %s4418_s13 = sshll.u32 %s2824_s11, 1  ;;  %p2830_p13 = pnand %p2471_p12, %p2799_p4 }
  0x1d   : > { %s2440_s15 = sshll.u32 %s2707_s25, 5  ;;  %s4642_s2 = sld [smem:[#allocation112_spill]] }
  0x1e   : > { %s218_s19 = scalar_lea.vmem [#allocation10], %s4418_s13  ;;  %s4643_s3 = sld [smem:[#allocation113_spill]] }
  0x1f   : > { %s226_s20 = sshll.u32 %s218_s19, 4  ;;  %s2845_s30 = scalar_lea.sflag [#allocation11], %s214_s12  ;;  %s227_s20 = int_to_ptr.vmem [resolvable:$true] %s226_s20 }
  0x20   : > { %p2543_p0 = pneg %p2830_p13  ;;  %s2554_s28 = scalar_lea.vmem %s227_s20, 32 }
  0x21   : > { %p2555_p1 = scmp.ne.s32.totalorder %s227_s20, %s2554_s28  ;;  %s2714_s16 = smov [#allocation10]  }
  0x22   : > { %s2559_s17 = sshll.u32 %s2714_s16, 4  ;;  %s2560_s17 = int_to_ptr.vmem [resolvable:$false] %s2559_s17 }
  0x23   : > { %s224_s18 = scalar_lea.hbm %s4642_s2, %s2440_s15  ;;  %p2557_p2 = pnand %p2555_p1, %p2543_p0 }
  0x24   : > { %s2843_s6 = scalar_lea.hbm %s4643_s3, %s2440_s15  ;;  %s2561_s19 = scalar_lea.vmem %s2560_s17, 64 }
  0x25   : > { %p2558_p3 = pneg %p2557_p2  ;;  %p2562_p4 = scmp.lt.s32.totalorder %s227_s20, %s2560_s17 }
  0x26   : > { %p2563_p5 = scmp.lt.s32.totalorder %s2561_s19, %s2554_s28 }
  0x28   : > { %p2564_p6 = por %p2563_p5, %p2562_p4 }
  0x2a   : > { %p2565_p7 = pnand %p2564_p6, %p2558_p3 }
  0x2c   : > { %2568 = shalt.err (!%p2565_p7)
}
  0x2d   : > { %2463 = dma.hbm_to_vmem [thread:$0]  (!%p2830_p13), %s224_s18, 32, %s227_s20, %s2845_s30  }
  0x2e   : > { %p2365_p10 = scmp.ge.s32.totalorder %s2711_s0, 1  ;;  %p257_p12 = scmp.lt.s32.totalorder %s2711_s0, 4 }
  0x2f   : > { %s2356_s28 = sshll.u32 %s2824_s11, 5  ;;  %s2439_s15 = sshll.u32 %s2707_s25, 9 }
  0x30   : > { %p2857_p1 = pnand %p2365_p10, %p257_p12  ;;  %s4645_s1 = sld [smem:[#allocation111_spill]] }
  0x31   : > { %s194_s17 = scalar_lea.vmem [#allocation7], %s2356_s28  ;;  %s191_s13 = scalar_lea.sflag [#allocation8], %s2824_s11 }
  0x32   : > { %s204_s19 = sshll.u32 %s194_s17, 4  ;;  %s2715_s18 = smov [#allocation7]   ;;  %s205_s19 = int_to_ptr.vmem [resolvable:$true] %s204_s19 }
  0x33   : > { %s2582_s2 = scalar_lea.vmem %s205_s19, 512  ;;  %s2587_s20 = sshll.u32 %s2715_s18, 4  ;;  %s2588_s20 = int_to_ptr.vmem [resolvable:$false] %s2587_s20 }
  0x34   : > { %p2583_p2 = scmp.ne.s32.totalorder %s205_s19, %s2582_s2  ;;  %s2589_s3 = scalar_lea.vmem %s2588_s20, 1024 }
  0x35   : > { %p2590_p5 = scmp.lt.s32.totalorder %s205_s19, %s2588_s20  ;;  %p2591_p6 = scmp.lt.s32.totalorder %s2589_s3, %s2582_s2 }
  0x36   : > { %s203_s16 = scalar_lea.hbm %s4645_s1, %s2439_s15  ;;  %p2585_p3 = pnand %p2583_p2, %p2543_p0 }
  0x37   : > { %p2592_p7 = por %p2591_p6, %p2590_p5 }
  0x38   : > { %p2586_p4 = pneg %p2585_p3 }
  0x3a   : > { %p2593_p10 = pnand %p2592_p7, %p2586_p4 }
  0x3c   : > { %2596 = shalt.err (!%p2593_p10)
}
  0x3d   : > { %s2716_s15 = smov 256   ;;  %s2717_s28 = smov 16  }
  0x3e   : > { %2460 = dma.hbm_to_vmem [thread:$0]  (!%p2830_p13), %s203_s16, 512, %s205_s19, %s191_s13, %s2716_s15, %s2716_s15, %s2717_s28  }
  0x3f   : > { %s4646_s27 = sshll.u32 %s2824_s11, 1  ;;  %s2718_s2 = smov [#allocation12]  }
  0x40   : > { %s237_s29 = scalar_lea.vmem [#allocation12], %s4646_s27  ;;  %s2615_s3 = sshll.u32 %s2718_s2, 4  ;;  %s2616_s3 = int_to_ptr.vmem [resolvable:$false] %s2615_s3 }
  0x41   : > { %s245_s17 = sshll.u32 %s237_s29, 4  ;;  %s2617_s18 = scalar_lea.vmem %s2616_s3, 64  ;;  %s246_s17 = int_to_ptr.vmem [resolvable:$true] %s245_s17 }
  0x42   : > { %s2610_s1 = scalar_lea.vmem %s246_s17, 32  ;;  %p2618_p4 = scmp.lt.s32.totalorder %s246_s17, %s2616_s3 }
  0x43   : > { %p2611_p12 = scmp.ne.s32.totalorder %s246_s17, %s2610_s1  ;;  %p2619_p5 = scmp.lt.s32.totalorder %s2617_s18, %s2610_s1 }
  0x45   : > { %p2613_p2 = pnand %p2611_p12, %p2543_p0  ;;  %p2620_p6 = por %p2619_p5, %p2618_p4 }
  0x47   : > { %p2614_p3 = pneg %p2613_p2 }
  0x49   : > { %p2621_p7 = pnand %p2620_p6, %p2614_p3 }
  0x4b   : > { %2624 = shalt.err (!%p2621_p7)
}
  0x4c   : > { %2466 = dma.hbm_to_vmem [thread:$0]  (!%p2830_p13), %s2843_s6, 32, %s246_s17, %s2845_s30  }
  0x4d   : > { %261 = sbr.rel (%p2857_p1) target bundleno = 944 (0x3b0), region = 36 }
  0x52   : > { %s2884_s11 = sand.u32 1, %s2695_s22  }
  0x53   : > { %s2366_s13 = sshll.u32 %s2884_s11, 5  ;;  %s264_s16 = scalar_lea.sflag [#allocation8], %s2884_s11 }
  0x54   : > { %s2888_s1 = scalar_lea.vmem [#allocation7], %s2366_s13 }
  0x55   : > { %2678 = dma.done.wait (%p2807_p8), %s264_s16, 512  }
  0x56   : > { %2680 = vsyncadd (%p2807_p8), %s264_s16, 4294966784  ;;  %s272_s14 = sand.u32 1, %s2787_s26   ;;  %s2367_s6 = sshll.u32 %s2884_s11, 1 }
  0x57   : > { %s273_s30 = scalar_lea.sflag [#allocation11], %s272_s14  ;;  %s276_s12 = scalar_lea.vmem [#allocation10], %s2367_s6 }
  0x58   : > { %2682 = dma.done.wait (%p2807_p8), %s273_s30, 64  }
  0x59   : > { %2684 = vsyncadd (%p2807_p8), %s273_s30, 4294967232  ;;  %v4419_v0 = vlaneseq  ;;  %s2901_s19 = sld [smem:[#allocation6 + %s2703_s24]]  ;;  %p324_p13 = scmp.lt.s32.totalorder %s2703_s24, 2  ;;  %v4647_v1 = vmov 0  ;;  %v2719_v2 = vmov 0.0  }
  0x5a   : > { %s2918_s27 = scalar_lea.vmem [#allocation12], %s2367_s6  ;;  %s322_s29 = scalar_lea.vmem [#allocation13], %s2884_s11 }
  0x5b   : > { %vm2905_vm0 = vcmp.lt.s32.totalorder %v4419_v0, 256  ;;  %s325_s26 = scalar_select %p324_p13, %s2703_s24, 2 }
  0x5c   : > { %v4648_v1 = vsel %vm2905_vm0, 4294967295, %v4647_v1  ;;  %337 = vst.msk [vmem:[#allocation2] sm:$0x3] %vm2905_vm0, %v2719_v2 }
  0x5d   : > { %4649 = vst [vmem:[#allocation19_spill] sm:$0xff] %v4648_v1  ;;  %s2369_s7 = sshll.u32 %s325_s26, 1 }
  0x5e   : > { %s2915_s28 = scalar_lea.vmem %s4415_s4, %s2369_s7 }
  0x5f   : > { %p338_p8 = scmp.gt.s32.totalorder %s2901_s19, 0 }
  0x60   : > { %v343_v3 = vld [vmem:[%s276_s12] sm:$0x3] (%p338_p8)  ;;  %v2924_v4 = vshrl.u32 (%p338_p8), %v4419_v0, 7  ;;  %v2720_v23 = vmov (%p338_p8), 0.0  }
  0x61   : > { %342 = sbr.rel (!%p338_p8) target bundleno = 141 (0x8d), region = 56  ;;  %v344_v5 = vand.u32 (%p338_p8), 255, %v343_v3  ;;  %v642_v6 = vshra.s32 (%p338_p8), %v343_v3, 8 }
  0x62   : > { %v380_v7 = vsub.s32 (%p338_p8), 0, %v2924_v4  ;;  %v384_v8 = vsub.s32 (%p338_p8), 1, %v2924_v4  ;;  %v347_v9 = vadd.s32 (%p338_p8), 8, %v2924_v4  ;;  %v348_v10 = vadd.s32 (%p338_p8), 16, %v2924_v4 }
  0x63   : > { %v349_v11 = vadd.s32 (%p338_p8), 24, %v2924_v4  ;;  %v350_v12 = vadd.s32 (%p338_p8), 32, %v2924_v4  ;;  %v351_v13 = vadd.s32 (%p338_p8), 40, %v2924_v4  ;;  %v352_v14 = vadd.s32 (%p338_p8), 48, %v2924_v4  ;;  %647 = vst.msk [vmem:[#allocation4] sm:$0x3] (%p338_p8), %vm2905_vm0, %v642_v6 }
  0x64   : > { %v2936_v15 = vrot.slane (%p338_p8), %v344_v5, %v380_v7  ;;  %v2938_v16 = vrot.slane (%p338_p8), %v344_v5, %v384_v8  ;;  %v353_v17 = vadd.s32 (%p338_p8), 56, %v2924_v4  ;;  %v354_v18 = vadd.s32 (%p338_p8), 64, %v2924_v4 }
  0x65   : > { %v355_v19 = vadd.s32 (%p338_p8), 72, %v2924_v4  ;;  %v2944_v20 = vadd.s32 (%p338_p8), 80, %v2924_v4  ;;  %v2947_v21 = vadd.s32 (%p338_p8), 88, %v2924_v4  ;;  %v2950_v22 = vadd.s32 (%p338_p8), 96, %v2924_v4 }
  0x66   : > { %vm386_vm1 = vcmp.eq.s32.totalorder %v2924_v4, %v2936_v15  ;;  %vm387_vm2 = vcmp.eq.s32.totalorder %v2924_v4, %v2938_v16  ;;  %vm388_vm3 = vcmp.eq.s32.totalorder %v347_v9, %v2936_v15  ;;  %vm389_vm4 = vcmp.eq.s32.totalorder %v347_v9, %v2938_v16 }
  0x67   : > { %v2371_v24 = vsel %vm386_vm1, 1.0, %v2720_v23  ;;  %v2372_v25 = vsel %vm387_vm2, 1.0, %v2720_v23  ;;  %v2373_v26 = vsel %vm388_vm3, 1.0, %v2720_v23  ;;  %v2374_v27 = vsel %vm389_vm4, 1.0, %v2720_v23 }
  0x68   : > { %578 = vst [vmem:[#allocation3 + $0xb0] sm:$0xff] %v2371_v24  ;;  %579 = vst [vmem:[#allocation3 + $0x1b0] sm:$0xff] %v2372_v25  ;;  %vm390_vm5 = vcmp.eq.s32.totalorder %v348_v10, %v2936_v15  ;;  %vm391_vm6 = vcmp.eq.s32.totalorder %v348_v10, %v2938_v16  ;;  %vm392_vm7 = vcmp.eq.s32.totalorder %v349_v11, %v2936_v15  ;;  %v359_v48 = vadd.s32 104, %v2924_v4 }
  0x69   : > { %580 = vst [vmem:[#allocation3 + $0xd8] sm:$0xff] %v2373_v26  ;;  %581 = vst [vmem:[#allocation3 + $0x18] sm:$0xff] %v2374_v27  ;;  %vm393_vm8 = vcmp.eq.s32.totalorder %v349_v11, %v2938_v16  ;;  %v2375_v28 = vsel %vm390_vm5, 1.0, %v2720_v23  ;;  %v2376_v29 = vsel %vm391_vm6, 1.0, %v2720_v23  ;;  %v2377_v30 = vsel %vm392_vm7, 1.0, %v2720_v23 }
  0x6a   : > { %v2378_v31 = vsel %vm393_vm8, 1.0, %v2720_v23  ;;  %582 = vst [vmem:[#allocation3 + $0x50] sm:$0xff] %v2375_v28  ;;  %583 = vst [vmem:[#allocation3 + $0x168] sm:$0xff] %v2376_v29  ;;  %vm394_vm9 = vcmp.eq.s32.totalorder %v350_v12, %v2936_v15  ;;  %vm395_vm10 = vcmp.eq.s32.totalorder %v350_v12, %v2938_v16  ;;  %vm396_vm11 = vcmp.eq.s32.totalorder %v351_v13, %v2936_v15 }
  0x6b   : > { %584 = vst [vmem:[#allocation3 + $0x130] sm:$0xff] %v2377_v30  ;;  %585 = vst [vmem:[#allocation3 + $0x48] sm:$0xff] %v2378_v31  ;;  %vm397_vm12 = vcmp.eq.s32.totalorder %v351_v13, %v2938_v16  ;;  %v2379_v32 = vsel %vm394_vm9, 1.0, %v2720_v23  ;;  %v2380_v33 = vsel %vm395_vm10, 1.0, %v2720_v23  ;;  %v2381_v34 = vsel %vm396_vm11, 1.0, %v2720_v23 }
  0x6c   : > { %v2382_v35 = vsel %vm397_vm12, 1.0, %v2720_v23  ;;  %586 = vst [vmem:[#allocation3 + $0x180] sm:$0xff] %v2379_v32  ;;  %587 = vst [vmem:[#allocation3 + $0x110] sm:$0xff] %v2380_v33  ;;  %vm398_vm13 = vcmp.eq.s32.totalorder %v352_v14, %v2936_v15  ;;  %vm399_vm14 = vcmp.eq.s32.totalorder %v352_v14, %v2938_v16  ;;  %vm400_vm15 = vcmp.eq.s32.totalorder %v353_v17, %v2936_v15 }
  0x6d   : > { %588 = vst [vmem:[#allocation3 + $0x118] sm:$0xff] %v2381_v34  ;;  %589 = vst [vmem:[#allocation3 + $0x98] sm:$0xff] %v2382_v35  ;;  %vm401_vm1 = vcmp.eq.s32.totalorder %v353_v17, %v2938_v16  ;;  %v2383_v36 = vsel %vm398_vm13, 1.0, %v2720_v23  ;;  %v2384_v37 = vsel %vm399_vm14, 1.0, %v2720_v23  ;;  %v2385_v38 = vsel %vm400_vm15, 1.0, %v2720_v23 }
  0x6e   : > { %v2386_v39 = vsel %vm401_vm1, 1.0, %v2720_v23  ;;  %590 = vst [vmem:[#allocation3 + $0x120] sm:$0xff] %v2383_v36  ;;  %591 = vst [vmem:[#allocation3 + $0x150] sm:$0xff] %v2384_v37  ;;  %vm402_vm2 = vcmp.eq.s32.totalorder %v354_v18, %v2936_v15  ;;  %vm403_vm3 = vcmp.eq.s32.totalorder %v354_v18, %v2938_v16  ;;  %vm404_vm4 = vcmp.eq.s32.totalorder %v355_v19, %v2936_v15 }
  0x6f   : > { %592 = vst [vmem:[#allocation3 + $0x108] sm:$0xff] %v2385_v38  ;;  %593 = vst [vmem:[#allocation3 + $0x60] sm:$0xff] %v2386_v39  ;;  %vm405_vm5 = vcmp.eq.s32.totalorder %v355_v19, %v2938_v16  ;;  %v2387_v40 = vsel %vm402_vm2, 1.0, %v2720_v23  ;;  %v2388_v41 = vsel %vm403_vm3, 1.0, %v2720_v23  ;;  %v2389_v42 = vsel %vm404_vm4, 1.0, %v2720_v23 }
  0x70   : > { %v2390_v43 = vsel %vm405_vm5, 1.0, %v2720_v23  ;;  %594 = vst [vmem:[#allocation3 + $0xe0] sm:$0xff] %v2387_v40  ;;  %595 = vst [vmem:[#allocation3 + $0x188] sm:$0xff] %v2388_v41  ;;  %vm406_vm6 = vcmp.eq.s32.totalorder %v2944_v20, %v2936_v15  ;;  %vm407_vm7 = vcmp.eq.s32.totalorder %v2944_v20, %v2938_v16  ;;  %vm408_vm8 = vcmp.eq.s32.totalorder %v2947_v21, %v2936_v15 }
  0x71   : > { %596 = vst [vmem:[#allocation3 + $0x138] sm:$0xff] %v2389_v42  ;;  %597 = vst [vmem:[#allocation3 + $0x140] sm:$0xff] %v2390_v43  ;;  %vm409_vm9 = vcmp.eq.s32.totalorder %v2947_v21, %v2938_v16  ;;  %v2391_v44 = vsel %vm406_vm6, 1.0, %v2720_v23  ;;  %v2392_v45 = vsel %vm407_vm7, 1.0, %v2720_v23  ;;  %v2393_v46 = vsel %vm408_vm8, 1.0, %v2720_v23 }
  0x72   : > { %v2394_v47 = vsel %vm409_vm9, 1.0, %v2720_v23  ;;  %598 = vst [vmem:[#allocation3 + $0x80] sm:$0xff] %v2391_v44  ;;  %599 = vst [vmem:[#allocation3 + $0x1a8] sm:$0xff] %v2392_v45  ;;  %vm410_vm10 = vcmp.eq.s32.totalorder %v2950_v22, %v2936_v15  ;;  %vm411_vm11 = vcmp.eq.s32.totalorder %v2950_v22, %v2938_v16  ;;  %v360_v49 = vadd.s32 112, %v2924_v4 }
  0x73   : > { %600 = vst [vmem:[#allocation3 + $0x1b8] sm:$0xff] %v2393_v46  ;;  %601 = vst [vmem:[#allocation3 + $0x28] sm:$0xff] %v2394_v47  ;;  %v2395_v50 = vsel %vm410_vm10, 1.0, %v2720_v23  ;;  %v2396_v51 = vsel %vm411_vm11, 1.0, %v2720_v23  ;;  %v361_v52 = vadd.s32 120, %v2924_v4  ;;  %v362_v53 = vadd.s32 128, %v2924_v4 }
  0x74   : > { %602 = vst [vmem:[#allocation3 + $0x1e8] sm:$0xff] %v2395_v50  ;;  %603 = vst [vmem:[#allocation3 + $0xf8] sm:$0xff] %v2396_v51  ;;  %vm412_vm12 = vcmp.eq.s32.totalorder %v359_v48, %v2936_v15  ;;  %vm413_vm13 = vcmp.eq.s32.totalorder %v359_v48, %v2938_v16  ;;  %vm414_vm14 = vcmp.eq.s32.totalorder %v360_v49, %v2936_v15  ;;  %v363_v62 = vadd.s32 136, %v2924_v4 }
  0x75   : > { %vm415_vm15 = vcmp.eq.s32.totalorder %v360_v49, %v2938_v16  ;;  %v2397_v54 = vsel %vm412_vm12, 1.0, %v2720_v23  ;;  %v2398_v55 = vsel %vm413_vm13, 1.0, %v2720_v23  ;;  %v2399_v56 = vsel %vm414_vm14, 1.0, %v2720_v23 }
  0x76   : > { %v2400_v57 = vsel %vm415_vm15, 1.0, %v2720_v23  ;;  %604 = vst [vmem:[#allocation3 + $0x160] sm:$0xff] %v2397_v54  ;;  %605 = vst [vmem:[#allocation3 + $0x30] sm:$0xff] %v2398_v55  ;;  %vm416_vm1 = vcmp.eq.s32.totalorder %v361_v52, %v2936_v15  ;;  %vm417_vm2 = vcmp.eq.s32.totalorder %v361_v52, %v2938_v16  ;;  %vm418_vm3 = vcmp.eq.s32.totalorder %v362_v53, %v2936_v15 }
  0x77   : > { %606 = vst [vmem:[#allocation3 + $0x1e0] sm:$0xff] %v2399_v56  ;;  %607 = vst [vmem:[#allocation3] sm:$0xff] %v2400_v57  ;;  %vm419_vm4 = vcmp.eq.s32.totalorder %v362_v53, %v2938_v16  ;;  %v2401_v58 = vsel %vm416_vm1, 1.0, %v2720_v23  ;;  %v2402_v59 = vsel %vm417_vm2, 1.0, %v2720_v23  ;;  %v2403_v60 = vsel %vm418_vm3, 1.0, %v2720_v23 }
  0x78   : > { %v2404_v61 = vsel %vm419_vm4, 1.0, %v2720_v23  ;;  %608 = vst [vmem:[#allocation3 + $0xf0] sm:$0xff] %v2401_v58  ;;  %609 = vst [vmem:[#allocation3 + $0x8] sm:$0xff] %v2402_v59  ;;  %v364_v63 = vadd.s32 144, %v2924_v4  ;;  %v365_v2 = vadd.s32 152, %v2924_v4  ;;  %v366_v3 = vadd.s32 160, %v2924_v4 }
  0x79   : > { %610 = vst [vmem:[#allocation3 + $0x148] sm:$0xff] %v2403_v60  ;;  %611 = vst [vmem:[#allocation3 + $0x1d0] sm:$0xff] %v2404_v61  ;;  %v367_v5 = vadd.s32 168, %v2924_v4  ;;  %v368_v6 = vadd.s32 176, %v2924_v4  ;;  %v369_v7 = vadd.s32 184, %v2924_v4  ;;  %v370_v8 = vadd.s32 192, %v2924_v4 }
  0x7a   : > { %vm420_vm5 = vcmp.eq.s32.totalorder %v363_v62, %v2936_v15  ;;  %vm421_vm6 = vcmp.eq.s32.totalorder %v363_v62, %v2938_v16  ;;  %vm422_vm7 = vcmp.eq.s32.totalorder %v364_v63, %v2936_v15  ;;  %vm423_vm8 = vcmp.eq.s32.totalorder %v364_v63, %v2938_v16 }
  0x7b   : > { %v2405_v9 = vsel %vm420_vm5, 1.0, %v2720_v23  ;;  %v2406_v10 = vsel %vm421_vm6, 1.0, %v2720_v23  ;;  %v2407_v11 = vsel %vm422_vm7, 1.0, %v2720_v23  ;;  %v2408_v12 = vsel %vm423_vm8, 1.0, %v2720_v23 }
  0x7c   : > { %612 = vst [vmem:[#allocation3 + $0x100] sm:$0xff] %v2405_v9  ;;  %613 = vst [vmem:[#allocation3 + $0xc8] sm:$0xff] %v2406_v10  ;;  %vm424_vm9 = vcmp.eq.s32.totalorder %v365_v2, %v2936_v15  ;;  %vm425_vm10 = vcmp.eq.s32.totalorder %v365_v2, %v2938_v16  ;;  %vm426_vm11 = vcmp.eq.s32.totalorder %v366_v3, %v2936_v15  ;;  %v371_v28 = vadd.s32 200, %v2924_v4 }
  0x7d   : > { %614 = vst [vmem:[#allocation3 + $0x40] sm:$0xff] %v2407_v11  ;;  %615 = vst [vmem:[#allocation3 + $0x1f8] sm:$0xff] %v2408_v12  ;;  %vm427_vm12 = vcmp.eq.s32.totalorder %v366_v3, %v2938_v16  ;;  %v2409_v13 = vsel %vm424_vm9, 1.0, %v2720_v23  ;;  %v2410_v14 = vsel %vm425_vm10, 1.0, %v2720_v23  ;;  %v2411_v17 = vsel %vm426_vm11, 1.0, %v2720_v23 }
  0x7e   : > { %v2412_v18 = vsel %vm427_vm12, 1.0, %v2720_v23  ;;  %616 = vst [vmem:[#allocation3 + $0x20] sm:$0xff] %v2409_v13  ;;  %617 = vst [vmem:[#allocation3 + $0x128] sm:$0xff] %v2410_v14  ;;  %vm428_vm13 = vcmp.eq.s32.totalorder %v367_v5, %v2936_v15  ;;  %vm429_vm14 = vcmp.eq.s32.totalorder %v367_v5, %v2938_v16  ;;  %vm430_vm15 = vcmp.eq.s32.totalorder %v368_v6, %v2936_v15 }
  0x7f   : > { %618 = vst [vmem:[#allocation3 + $0x1a0] sm:$0xff] %v2411_v17  ;;  %619 = vst [vmem:[#allocation3 + $0x1f0] sm:$0xff] %v2412_v18  ;;  %vm431_vm1 = vcmp.eq.s32.totalorder %v368_v6, %v2938_v16  ;;  %v2413_v19 = vsel %vm428_vm13, 1.0, %v2720_v23  ;;  %v2414_v20 = vsel %vm429_vm14, 1.0, %v2720_v23  ;;  %v2415_v21 = vsel %vm430_vm15, 1.0, %v2720_v23 }
  0x80   : > { %v2416_v22 = vsel %vm431_vm1, 1.0, %v2720_v23  ;;  %620 = vst [vmem:[#allocation3 + $0xe8] sm:$0xff] %v2413_v19  ;;  %621 = vst [vmem:[#allocation3 + $0x78] sm:$0xff] %v2414_v20  ;;  %vm432_vm2 = vcmp.eq.s32.totalorder %v369_v7, %v2936_v15  ;;  %vm433_vm3 = vcmp.eq.s32.totalorder %v369_v7, %v2938_v16  ;;  %vm434_vm4 = vcmp.eq.s32.totalorder %v370_v8, %v2936_v15 }
  0x81   : > { %622 = vst [vmem:[#allocation3 + $0x70] sm:$0xff] %v2415_v21  ;;  %623 = vst [vmem:[#allocation3 + $0x90] sm:$0xff] %v2416_v22  ;;  %vm435_vm5 = vcmp.eq.s32.totalorder %v370_v8, %v2938_v16  ;;  %v2417_v24 = vsel %vm432_vm2, 1.0, %v2720_v23  ;;  %v2418_v25 = vsel %vm433_vm3, 1.0, %v2720_v23  ;;  %v2419_v26 = vsel %vm434_vm4, 1.0, %v2720_v23 }
  0x82   : > { %v2420_v27 = vsel %vm435_vm5, 1.0, %v2720_v23  ;;  %624 = vst [vmem:[#allocation3 + $0x1d8] sm:$0xff] %v2417_v24  ;;  %625 = vst [vmem:[#allocation3 + $0xd0] sm:$0xff] %v2418_v25  ;;  %v372_v29 = vadd.s32 208, %v2924_v4  ;;  %v373_v30 = vadd.s32 216, %v2924_v4  ;;  %v374_v31 = vadd.s32 224, %v2924_v4 }
  0x83   : > { %626 = vst [vmem:[#allocation3 + $0xb8] sm:$0xff] %v2419_v26  ;;  %627 = vst [vmem:[#allocation3 + $0x88] sm:$0xff] %v2420_v27  ;;  %v375_v32 = vadd.s32 232, %v2924_v4  ;;  %v376_v33 = vadd.s32 240, %v2924_v4  ;;  %v377_v34 = vadd.s32 248, %v2924_v4  ;;  %vm436_vm6 = vcmp.eq.s32.totalorder %v371_v28, %v2936_v15 }
  0x84   : > { %vm437_vm7 = vcmp.eq.s32.totalorder %v371_v28, %v2938_v16  ;;  %vm438_vm8 = vcmp.eq.s32.totalorder %v372_v29, %v2936_v15  ;;  %vm439_vm9 = vcmp.eq.s32.totalorder %v372_v29, %v2938_v16  ;;  %v2421_v35 = vsel %vm436_vm6, 1.0, %v2720_v23 }
  0x85   : > { %v2422_v36 = vsel %vm437_vm7, 1.0, %v2720_v23  ;;  %v2423_v37 = vsel %vm438_vm8, 1.0, %v2720_v23  ;;  %v2424_v38 = vsel %vm439_vm9, 1.0, %v2720_v23  ;;  %628 = vst [vmem:[#allocation3 + $0xa8] sm:$0xff] %v2421_v35  ;;  %vm440_vm10 = vcmp.eq.s32.totalorder %v373_v30, %v2936_v15 }
  0x86   : > { %629 = vst [vmem:[#allocation3 + $0x1c8] sm:$0xff] %v2422_v36  ;;  %630 = vst [vmem:[#allocation3 + $0x170] sm:$0xff] %v2423_v37  ;;  %vm441_vm11 = vcmp.eq.s32.totalorder %v373_v30, %v2938_v16  ;;  %vm442_vm12 = vcmp.eq.s32.totalorder %v374_v31, %v2936_v15  ;;  %vm443_vm13 = vcmp.eq.s32.totalorder %v374_v31, %v2938_v16  ;;  %v2425_v4 = vsel %vm440_vm10, 1.0, %v2720_v23 }
  0x87   : > { %631 = vst [vmem:[#allocation3 + $0x178] sm:$0xff] %v2424_v38  ;;  %v2426_v39 = vsel %vm441_vm11, 1.0, %v2720_v23  ;;  %v2427_v40 = vsel %vm442_vm12, 1.0, %v2720_v23  ;;  %v2428_v41 = vsel %vm443_vm13, 1.0, %v2720_v23  ;;  %632 = vst [vmem:[#allocation3 + $0x68] sm:$0xff] %v2425_v4  ;;  %vm444_vm14 = vcmp.eq.s32.totalorder %v375_v32, %v2936_v15 }
  0x88   : > { %633 = vst [vmem:[#allocation3 + $0x190] sm:$0xff] %v2426_v39  ;;  %634 = vst [vmem:[#allocation3 + $0x198] sm:$0xff] %v2427_v40  ;;  %vm445_vm15 = vcmp.eq.s32.totalorder %v375_v32, %v2938_v16  ;;  %vm446_vm1 = vcmp.eq.s32.totalorder %v376_v33, %v2936_v15  ;;  %vm447_vm2 = vcmp.eq.s32.totalorder %v376_v33, %v2938_v16  ;;  %v2429_v42 = vsel %vm444_vm14, 1.0, %v2720_v23 }
  0x89   : > { %635 = vst [vmem:[#allocation3 + $0x38] sm:$0xff] %v2428_v41  ;;  %v2430_v43 = vsel %vm445_vm15, 1.0, %v2720_v23  ;;  %v2431_v44 = vsel %vm446_vm1, 1.0, %v2720_v23  ;;  %v2432_v45 = vsel %vm447_vm2, 1.0, %v2720_v23  ;;  %636 = vst [vmem:[#allocation3 + $0xc0] sm:$0xff] %v2429_v42  ;;  %vm448_vm3 = vcmp.eq.s32.totalorder %v377_v34, %v2936_v15 }
  0x8a   : > { %637 = vst [vmem:[#allocation3 + $0x1c0] sm:$0xff] %v2430_v43  ;;  %638 = vst [vmem:[#allocation3 + $0x158] sm:$0xff] %v2431_v44  ;;  %vm449_vm4 = vcmp.eq.s32.totalorder %v377_v34, %v2938_v16  ;;  %v2433_v46 = vsel %vm448_vm3, 1.0, %v2720_v23 }
  0x8b   : > { %639 = vst [vmem:[#allocation3 + $0x10] sm:$0xff] %v2432_v45  ;;  %v2434_v47 = vsel %vm449_vm4, 1.0, %v2720_v23  ;;  %640 = vst [vmem:[#allocation3 + $0x58] sm:$0xff] %v2433_v46 }
  0x8c   : > { %641 = vst [vmem:[#allocation3 + $0xa0] sm:$0xff] %v2434_v47 }
  0x8d PF: > { %p2435_p0 = scmp.le.s32.totalorder %s2901_s19, 0 }
  0x8f   : > { %650 = sbr.rel (%p2435_p0) target bundleno = 602 (0x25a), region = 60 }
  0x94   : > { %v686_v48 = vld [vmem:[#allocation3 + $0x8] sm:$0xff]  ;;  %v685_v49 = vld [vmem:[#allocation3 + $0xf0] sm:$0xff]  ;;  %v684_v50 = vld [vmem:[#allocation3] sm:$0xff] }
  0x95   : > { %v3108_v51 = vand.u32 4294901760, %v686_v48  ;;  %v3110_v52 = vand.u32 4294901760, %v685_v49  ;;  %v3112_v15 = vand.u32 4294901760, %v684_v50  ;;  %v683_v16 = vld [vmem:[#allocation3 + $0x1e0] sm:$0xff]  ;;  %v682_v53 = vld [vmem:[#allocation3 + $0x30] sm:$0xff]  ;;  %v680_v57 = vld [vmem:[#allocation3 + $0xf8] sm:$0xff] }
  0x96   : > { %v681_v54 = vld [vmem:[#allocation3 + $0x160] sm:$0xff]  ;;  %v3114_v55 = vand.u32 4294901760, %v683_v16  ;;  %v3116_v23 = vand.u32 4294901760, %v682_v53  ;;  %v679_v58 = vld [vmem:[#allocation3 + $0x1e8] sm:$0xff]  ;;  %v3121_v60 = vand.u32 4294901760, %v680_v57  ;;  %v3130_v2 = vld [vmem:[#allocation3 + $0x1b8] sm:$0xff] }
  0x97   : > { %v3118_v56 = vand.u32 4294901760, %v681_v54  ;;  %v678_v59 = vld [vmem:[#allocation3 + $0x28] sm:$0xff]  ;;  %720 = vmatprep.subr.mxu0 %v3108_v51  ;;  %v3123_v61 = vand.u32 4294901760, %v679_v58  ;;  %v3128_v63 = vsub.f32 %v686_v48, %v3108_v51  ;;  %v3134_v5 = vld [vmem:[#allocation3 + $0x80] sm:$0xff]  ;;  %v3138_v6 = vand.u32 4294901760, %v3130_v2  ;;  %v3151_v11 = vld [vmem:[#allocation3 + $0x138] sm:$0xff] }
  0x98   : > { %v3125_v62 = vand.u32 4294901760, %v678_v59  ;;  %v3132_v3 = vld [vmem:[#allocation3 + $0x1a8] sm:$0xff]  ;;  %722 = vmatpush1.msra.mxu0 %v3110_v52  ;;  %v3141_v7 = vsub.f32 %v685_v49, %v3110_v52  ;;  %v3147_v9 = vsub.f32 %v684_v50, %v3112_v15  ;;  %v3149_v10 = vld [vmem:[#allocation3 + $0x140] sm:$0xff]  ;;  %v3158_v14 = vand.u32 4294901760, %v3134_v5  ;;  %v3216_v42 = vld [vmem:[#allocation3 + $0x150] sm:$0xff] }
  0x99   : > { %v3144_v8 = vand.u32 4294901760, %v3132_v3  ;;  %v3153_v12 = vld [vmem:[#allocation3 + $0x188] sm:$0xff]  ;;  %724 = vmatprep.subr.mxu0 %v3112_v15  ;;  %v4432_v13 = vand.u32 4294901760, %v3128_v63  ;;  %v3161_v17 = vsub.f32 %v683_v16, %v3114_v55  ;;  %v3164_v18 = vand.u32 4294901760, %v3149_v10  ;;  %v3175_v24 = vld [vmem:[#allocation3 + $0xe0] sm:$0xff] }
  0x9a   : > { %4651 = vst [vmem:[#allocation21_spill] sm:$0xff] %v3158_v14  ;;  %726 = vmatpush1.msra.mxu0 %v3114_v55  ;;  %v4431_v19 = vand.u32 4294901760, %v3141_v7  ;;  %v4429_v20 = vand.u32 4294901760, %v3147_v9  ;;  %v3170_v21 = vsub.f32 %v682_v53, %v3116_v23  ;;  %v3173_v22 = vand.u32 4294901760, %v3151_v11  ;;  %v3199_v33 = vld [vmem:[#allocation3 + $0x60] sm:$0xff]  ;;  %v3209_v38 = vld [vmem:[#allocation3 + $0x108] sm:$0xff] }
  0x9b   : > { %4650 = vst [vmem:[#allocation20_spill] sm:$0xff] %v3144_v8  ;;  %4652 = vst [vmem:[#allocation22_spill] sm:$0xff] %v3164_v18  ;;  %728 = vmatprep.subr.mxu0 %v3116_v23  ;;  %v883_v25 = vsub.f32 %v3128_v63, %v4432_v13  ;;  %v4427_v26 = vand.u32 4294901760, %v3161_v17  ;;  %v3183_v27 = vsub.f32 %v681_v54, %v3118_v56  ;;  %v3186_v28 = vand.u32 4294901760, %v3153_v12  ;;  %v3228_v47 = vld [vmem:[#allocation3 + $0x120] sm:$0xff]  ;;  %v3240_v53 = vld [vmem:[#allocation3 + $0x98] sm:$0xff] }
  0x9c   : > { %4653 = vst [vmem:[#allocation23_spill] sm:$0xff] %v3173_v22  ;;  %730 = vmatpush1.msra.mxu0 %v3118_v56  ;;  %v889_v29 = vsub.f32 %v3141_v7, %v4431_v19  ;;  %v895_v30 = vsub.f32 %v3147_v9, %v4429_v20  ;;  %v4426_v31 = vand.u32 4294901760, %v3170_v21  ;;  %v3197_v32 = vsub.f32 %v680_v57, %v3121_v60  ;;  %v3331_v20 = vld [vmem:[#allocation3 + $0x168] sm:$0xff]  ;;  %v3341_v19 = vld [vmem:[#allocation3 + $0x50] sm:$0xff] }
  0x9d   : > { %4654 = vst [vmem:[#allocation24_spill] sm:$0xff] %v3186_v28  ;;  %732 = vmatprep.subr.mxu0 %v3121_v60  ;;  %v884_v34 = vand.u32 4294901760, %v883_v25  ;;  %v901_v35 = vsub.f32 %v3161_v17, %v4427_v26  ;;  %v4424_v36 = vand.u32 4294901760, %v3183_v27  ;;  %v3207_v37 = vand.u32 4294901760, %v3175_v24 }
  0x9e   : > { %734 = vmatpush1.msra.mxu0 %v3123_v61  ;;  %v890_v4 = vand.u32 4294901760, %v889_v29  ;;  %v896_v39 = vand.u32 4294901760, %v895_v30  ;;  %v907_v40 = vsub.f32 %v3170_v21, %v4426_v31  ;;  %v4422_v41 = vand.u32 4294901760, %v3197_v32  ;;  %v3318_v31 = vld [vmem:[#allocation3 + $0x130] sm:$0xff] }
  0x9f   : > { %4655 = vst [vmem:[#allocation25_spill] sm:$0xff] %v3207_v37  ;;  %736 = vmatprep.subr.mxu0 %v3125_v62  ;;  %885 = vmatprep.subr.mxu1 %v884_v34  ;;  %v902_v43 = vand.u32 4294901760, %v901_v35  ;;  %v913_v44 = vsub.f32 %v3183_v27, %v4424_v36  ;;  %v3223_v45 = vsub.f32 %v679_v58, %v3123_v61  ;;  %v3226_v46 = vand.u32 4294901760, %v3199_v33 }
  0xa0   : > { %738 = vmatpush1.msra.mxu0 %v3138_v6  ;;  %891 = vmatpush1.msra.mxu1 %v890_v4  ;;  %v908_v48 = vand.u32 4294901760, %v907_v40  ;;  %v919_v49 = vsub.f32 %v3197_v32, %v4422_v41  ;;  %v3235_v50 = vsub.f32 %v678_v59, %v3125_v62  ;;  %v3238_v16 = vand.u32 4294901760, %v3209_v38  ;;  %v3251_v59 = vld [vmem:[#allocation3 + $0x118] sm:$0xff] }
  0xa1   : > { %4656 = vst [vmem:[#allocation26_spill] sm:$0xff] %v3226_v46  ;;  %740 = vmatprep.subr.mxu0 %v3144_v8  ;;  %897 = vmatprep.subr.mxu1 %v896_v39  ;;  %v914_v54 = vand.u32 4294901760, %v913_v44  ;;  %v4421_v57 = vand.u32 4294901760, %v3223_v45  ;;  %v3246_v58 = vsub.f32 %v3130_v2, %v3138_v6  ;;  %v3249_v25 = vand.u32 4294901760, %v3216_v42 }
  0xa2   : > { %4657 = vst [vmem:[#allocation27_spill] sm:$0xff] %v3238_v16  ;;  %742 = vmatpush1.msra.mxu0 %v3158_v14  ;;  %903 = vmatpush1.msra.mxu1 %v902_v43  ;;  %v920_v29 = vand.u32 4294901760, %v919_v49  ;;  %v4420_v30 = vand.u32 4294901760, %v3235_v50  ;;  %v3257_v34 = vsub.f32 %v3132_v3, %v3144_v8  ;;  %v3260_v35 = vand.u32 4294901760, %v3228_v47  ;;  %v3274_v3 = vld [vmem:[#allocation3 + $0x110] sm:$0xff] }
  0xa3   : > { %4658 = vst [vmem:[#allocation28_spill] sm:$0xff] %v3249_v25  ;;  %744 = vmatprep.subr.mxu0 %v3164_v18  ;;  %909 = vmatprep.subr.mxu1 %v908_v48  ;;  %v925_v2 = vsub.f32 %v3223_v45, %v4421_v57  ;;  %v4423_v4 = vand.u32 4294901760, %v3246_v58  ;;  %v3269_v39 = vsub.f32 %v3134_v5, %v3158_v14  ;;  %v3272_v40 = vand.u32 4294901760, %v3240_v53  ;;  %v3297_v57 = vld [vmem:[#allocation3 + $0x180] sm:$0xff] }
  0xa4   : > { %4659 = vst [vmem:[#allocation29_spill] sm:$0xff] %v3260_v35  ;;  %746 = vmatpush1.msra.mxu0 %v3173_v22  ;;  %915 = vmatpush1.msra.mxu1 %v914_v54  ;;  %v931_v43 = vsub.f32 %v3235_v50, %v4420_v30  ;;  %v4425_v44 = vand.u32 4294901760, %v3257_v34  ;;  %v3283_v48 = vsub.f32 %v3149_v10, %v3164_v18  ;;  %v3286_v5 = vand.u32 4294901760, %v3251_v59 }
  0xa5   : > { %4660 = vst [vmem:[#allocation30_spill] sm:$0xff] %v3272_v40  ;;  %748 = vmatprep.subr.mxu0 %v3186_v28  ;;  %921 = vmatprep.subr.mxu1 %v920_v29  ;;  %v926_v49 = vand.u32 4294901760, %v925_v2  ;;  %v937_v54 = vsub.f32 %v3246_v58, %v4423_v4  ;;  %v4428_v0 = vand.u32 4294901760, %v3269_v39  ;;  %v3295_v30 = vsub.f32 %v3151_v11, %v3173_v22  ;;  %v3307_v4 = vld [vmem:[#allocation3 + $0x48] sm:$0xff]  ;;  %v3421_v22 = vld [vmem:[#allocation3 + $0xa0] sm:$0xff] }
  0xa6   : > { %4661 = vst [vmem:[#allocation31_spill] sm:$0xff] %v3286_v5  ;;  %750 = vmatpush1.msra.mxu0 %v3207_v37  ;;  %v932_v10 = vand.u32 4294901760, %v931_v43  ;;  %v943_v29 = vsub.f32 %v3257_v34, %v4425_v44  ;;  %v4430_v2 = vand.u32 4294901760, %v3283_v48  ;;  %v3305_v41 = vand.u32 4294901760, %v3274_v3 }
  0xa7   : > { %927 = vmatpush1.msra.mxu1 %v926_v49  ;;  %752 = vmatprep.subr.mxu0 %v3226_v46  ;;  %v938_v11 = vand.u32 4294901760, %v937_v54  ;;  %v949_v36 = vsub.f32 %v3269_v39, %v4428_v0  ;;  %v4433_v43 = vand.u32 4294901760, %v3295_v30  ;;  %v3316_v44 = vsub.f32 %v3153_v12, %v3186_v28 }
  0xa8   : > { %4662 = vst [vmem:[#allocation32_spill] sm:$0xff] %v3305_v41  ;;  %933 = vmatprep.subr.mxu1 %v932_v10  ;;  %754 = vmatpush1.msra.mxu0 %v3238_v16  ;;  %v944_v26 = vand.u32 4294901760, %v943_v29  ;;  %v955_v49 = vsub.f32 %v3283_v48, %v4430_v2  ;;  %v3325_v54 = vand.u32 4294901760, %v3297_v57  ;;  %v3329_v0 = vsub.f32 %v3175_v24, %v3207_v37 }
  0xa9   : > { %939 = vmatpush1.msra.mxu1 %v938_v11  ;;  %756 = vmatprep.subr.mxu0 %v3249_v25  ;;  %v950_v12 = vand.u32 4294901760, %v949_v36  ;;  %v961_v10 = vsub.f32 %v3295_v30, %v4433_v43  ;;  %v3339_v2 = vand.u32 4294901760, %v3307_v4  ;;  %v3347_v36 = vsub.f32 %v3199_v33, %v3226_v46  ;;  %v3352_v43 = vld [vmem:[#allocation3 + $0x18] sm:$0xff] }
  0xaa   : > { %4663 = vst [vmem:[#allocation33_spill] sm:$0xff] %v3325_v54  ;;  %945 = vmatprep.subr.mxu1 %v944_v26  ;;  %758 = vmatpush1.msra.mxu0 %v3260_v35  ;;  %v956_v24 = vand.u32 4294901760, %v955_v49  ;;  %v4439_v11 = vand.u32 4294901760, %v3329_v0  ;;  %v3350_v13 = vand.u32 4294901760, %v3318_v31  ;;  %v4666_v26 = vand.u32 4294901760, %v3316_v44 }
  0xab   : > { %4664 = vst [vmem:[#allocation34_spill] sm:$0xff] %v3339_v2  ;;  %951 = vmatpush1.msra.mxu1 %v950_v12  ;;  %760 = vmatprep.subr.mxu0 %v3272_v40  ;;  %v962_v29 = vand.u32 4294901760, %v961_v10  ;;  %v3360_v49 = vsub.f32 %v3209_v38, %v3238_v16  ;;  %v3363_v33 = vand.u32 4294901760, %v3331_v20  ;;  %v3372_v46 = vsub.f32 %v3216_v42, %v3249_v25  ;;  %v3377_v38 = vld [vmem:[#allocation3 + $0xd8] sm:$0xff]  ;;  %v3388_v42 = vld [vmem:[#allocation3 + $0x1b0] sm:$0xff] }
  0xac   : > { %4665 = vst [vmem:[#allocation35_spill] sm:$0xff] %v3350_v13  ;;  %v967_v1 = vsub.f32 %v3316_v44, %v4666_v26  ;;  %957 = vmatprep.subr.mxu1 %v956_v24  ;;  %762 = vmatpush1.msra.mxu0 %v3286_v5  ;;  %v973_v12 = vsub.f32 %v3329_v0, %v4439_v11  ;;  %v3375_v26 = vand.u32 4294901760, %v3341_v19  ;;  %v3386_v10 = vand.u32 4294901760, %v3352_v43 }
  0xad   : > { %4667 = vst [vmem:[#allocation36_spill] sm:$0xff] %v3363_v33  ;;  %963 = vmatpush1.msra.mxu1 %v962_v29  ;;  %764 = vmatprep.subr.mxu0 %v3305_v41  ;;  %v3383_v11 = vsub.f32 %v3228_v47, %v3260_v35  ;;  %v4671_v37 = vand.u32 4294901760, %v3347_v36  ;;  %v3397_v16 = vsub.f32 %v3240_v53, %v3272_v40  ;;  %v4673_v47 = vand.u32 4294901760, %v3360_v49 }
  0xae   : > { %4668 = vst [vmem:[#allocation37_spill] sm:$0xff] %v3375_v26  ;;  %v968_v24 = vand.u32 4294901760, %v967_v1  ;;  %4670 = vst [vmem:[#allocation39_spill] sm:$0xff] %v3386_v10  ;;  %766 = vmatpush1.msra.mxu0 %v3325_v54  ;;  %v974_v25 = vand.u32 4294901760, %v973_v12  ;;  %v3405_v12 = vand.u32 4294901760, %v3377_v38  ;;  %v3411_v1 = vld [vmem:[#allocation3 + $0xb0] sm:$0xff] }
  0xaf   : > { %4669 = vst [vmem:[#allocation38_spill] sm:$0xff] %v3383_v11  ;;  %v979_v29 = vsub.f32 %v3347_v36, %v4671_v37  ;;  %4672 = vst [vmem:[#allocation40_spill] sm:$0xff] %v3397_v16  ;;  %768 = vmatprep.subr.mxu0 %v3339_v2  ;;  %v985_v35 = vsub.f32 %v3360_v49, %v4673_v47  ;;  %v3409_v37 = vsub.f32 %v3251_v59, %v3286_v5 }
  0xb0   : > { %969 = vmatprep.subr.mxu1 %v968_v24  ;;  %4674 = vst [vmem:[#allocation41_spill] sm:$0xff] %v3405_v12  ;;  %770 = vmatpush1.msra.mxu0 %v3350_v13  ;;  %v4676_v24 = vand.u32 4294901760, %v3372_v46  ;;  %v3419_v28 = vand.u32 4294901760, %v3388_v42  ;;  %v4678_v59 = vand.u32 4294901760, %v3383_v11  ;;  %v3430_v5 = vsub.f32 %v3274_v3, %v3305_v41 }
  0xb1   : > { %4675 = vst [vmem:[#allocation42_spill] sm:$0xff] %v3409_v37  ;;  %975 = vmatpush1.msra.mxu1 %v974_v25  ;;  %v980_v53 = vand.u32 4294901760, %v979_v29  ;;  %v986_v18 = vand.u32 4294901760, %v985_v35  ;;  %772 = vmatprep.subr.mxu0 %v3363_v33  ;;  %v4680_v35 = vand.u32 4294901760, %v3397_v16  ;;  %v3439_v8 = vand.u32 4294901760, %v3411_v1  ;;  %v3445_v29 = vld [vmem:[#allocation3 + $0x10] sm:$0xff] }
  0xb2   : > { %v991_v40 = vsub.f32 %v3372_v46, %v4676_v24  ;;  %4677 = vst [vmem:[#allocation43_spill] sm:$0xff] %v3419_v28  ;;  %v997_v25 = vsub.f32 %v3383_v11, %v4678_v59  ;;  %4679 = vst [vmem:[#allocation44_spill] sm:$0xff] %v3430_v5  ;;  %v3432_v24 = vld [vmem:[#allocation3 + $0x58] sm:$0xff]  ;;  %774 = vmatpush1.msra.mxu0 %v3375_v26  ;;  %v3443_v59 = vsub.f32 %v3297_v57, %v3325_v54 }
  0xb3   : > { %981 = vmatprep.subr.mxu1 %v980_v53  ;;  %v1003_v14 = vsub.f32 %v3397_v16, %v4680_v35  ;;  %4681 = vst [vmem:[#allocation45_spill] sm:$0xff] %v3439_v8  ;;  %776 = vmatprep.subr.mxu0 %v3386_v10  ;;  %v3453_v35 = vand.u32 4294901760, %v3421_v22  ;;  %v3455_v16 = vld [vmem:[#allocation3 + $0x158] sm:$0xff]  ;;  %v3464_v54 = vand.u32 4294901760, %v3432_v24 }
  0xb4   : > { %v992_v47 = vand.u32 4294901760, %v991_v40  ;;  %4682 = vst [vmem:[#allocation46_spill] sm:$0xff] %v3443_v59  ;;  %987 = vmatpush1.msra.mxu1 %v986_v18  ;;  %v998_v3 = vand.u32 4294901760, %v997_v25  ;;  %v4683_v40 = vand.u32 4294901760, %v3409_v37  ;;  %778 = vmatpush1.msra.mxu0 %v3405_v12  ;;  %v3461_v25 = vsub.f32 %v3307_v4, %v3339_v2 }
  0xb5   : > { %4684 = vst [vmem:[#allocation47_spill] sm:$0xff] %v3453_v35  ;;  %v1004_v57 = vand.u32 4294901760, %v1003_v14  ;;  %4686 = vst [vmem:[#allocation49_spill] sm:$0xff] %v3464_v54  ;;  %780 = vmatprep.subr.mxu0 %v3419_v28  ;;  %v3474_v18 = vsub.f32 %v3318_v31, %v3350_v13  ;;  %v3477_v4 = vand.u32 4294901760, %v3445_v29  ;;  %v4690_v2 = vand.u32 4294901760, %v3443_v59  ;;  %v3491_v31 = vld [vmem:[#allocation3 + $0xc0] sm:$0xff] }
  0xb6   : > { %v1009_v53 = vsub.f32 %v3409_v37, %v4683_v40  ;;  %993 = vmatprep.subr.mxu1 %v992_v47  ;;  %4685 = vst [vmem:[#allocation48_spill] sm:$0xff] %v3461_v25  ;;  %v3466_v40 = vld [vmem:[#allocation3 + $0x1c0] sm:$0xff]  ;;  %v4687_v47 = vand.u32 4294901760, %v3430_v5  ;;  %782 = vmatpush1.msra.mxu0 %v3439_v8  ;;  %v3486_v37 = vsub.f32 %v3331_v20, %v3363_v33  ;;  %v3502_v20 = vld [vmem:[#allocation3 + $0x38] sm:$0xff] }
  0xb7   : > { %999 = vmatpush1.msra.mxu1 %v998_v3  ;;  %4688 = vst [vmem:[#allocation50_spill] sm:$0xff] %v3474_v18  ;;  %4689 = vst [vmem:[#allocation51_spill] sm:$0xff] %v3477_v4  ;;  %v1021_v3 = vsub.f32 %v3443_v59, %v4690_v2  ;;  %784 = vmatprep.subr.mxu0 %v3453_v35  ;;  %v3497_v2 = vsub.f32 %v3341_v19, %v3375_v26  ;;  %v4695_v59 = vand.u32 4294901760, %v3461_v25 }
  0xb8   : > { %v1010_v41 = vand.u32 4294901760, %v1009_v53  ;;  %v1015_v14 = vsub.f32 %v3430_v5, %v4687_v47  ;;  %1005 = vmatprep.subr.mxu1 %v1004_v57  ;;  %4691 = vst [vmem:[#allocation52_spill] sm:$0xff] %v3486_v37  ;;  %v3489_v47 = vand.u32 4294901760, %v3455_v16  ;;  %v4482_v57 = vand.u32 4294901760, %v3474_v18  ;;  %786 = vmatpush2.msra.mxu0 %v3464_v54 }
  0xb9   : > { %4693 = vst [vmem:[#allocation54_spill] sm:$0xff] %v3497_v2  ;;  %v3500_v53 = vand.u32 4294901760, %v3466_v40  ;;  %v1022_v33 = vand.u32 4294901760, %v1021_v3  ;;  %v1027_v5 = vsub.f32 %v3461_v25, %v4695_v59  ;;  %788 = vmatprep.subr.mxu0 %v3477_v4  ;;  %v3519_v26 = vand.u32 4294901760, %v3491_v31 }
  0xba   : > { %4692 = vst [vmem:[#allocation53_spill] sm:$0xff] %v3489_v47  ;;  %1011 = vmatpush1.msra.mxu1 %v1010_v41  ;;  %v1016_v13 = vand.u32 4294901760, %v1015_v14  ;;  %v3511_v14 = vsub.f32 %v3352_v43, %v3386_v10  ;;  %v1033_v19 = vsub.f32 %v3474_v18, %v4482_v57  ;;  %v3523_v59 = vsub.f32 %v3377_v38, %v3405_v12  ;;  %v3525_v41 = vld [vmem:[#allocation3 + $0x198] sm:$0xff]  ;;  %v3535_v18 = vld [vmem:[#allocation3 + $0x190] sm:$0xff] }
  0xbb   : > { %4694 = vst [vmem:[#allocation55_spill] sm:$0xff] %v3500_v53  ;;  %4697 = vst [vmem:[#allocation57_spill] sm:$0xff] %v3519_v26  ;;  %v1028_v43 = vand.u32 4294901760, %v1027_v5  ;;  %790 = vmatpush2.msra.mxu0 %v3489_v47  ;;  %v3533_v3 = vand.u32 4294901760, %v3502_v20  ;;  %v4701_v38 = vand.u32 4294901760, %v3497_v2  ;;  %v3557_v5 = vsub.f32 %v3411_v1, %v3439_v8  ;;  %v3580_v8 = vld [vmem:[#allocation3 + $0x1c8] sm:$0xff] }
  0xbc   : > { %4696 = vst [vmem:[#allocation56_spill] sm:$0xff] %v3511_v14  ;;  %1017 = vmatprep.subr.mxu1 %v1016_v13  ;;  %4698 = vst [vmem:[#allocation58_spill] sm:$0xff] %v3523_v59  ;;  %v4699_v13 = vand.u32 4294901760, %v3486_v37  ;;  %v1034_v25 = vand.u32 4294901760, %v1033_v19  ;;  %792 = vmatprep.subr.mxu0 %v3500_v53 }
  0xbd   : > { %1023 = vmatpush1.msra.mxu1 %v1022_v33  ;;  %4700 = vst [vmem:[#allocation59_spill] sm:$0xff] %v3533_v3  ;;  %v1045_v12 = vsub.f32 %v3497_v2, %v4701_v38  ;;  %v3544_v33 = vsub.f32 %v3388_v42, %v3419_v28  ;;  %794 = vmatpush2.msra.mxu0 %v3519_v26  ;;  %v3553_v38 = vand.u32 4294901760, %v3525_v41  ;;  %4705 = vst [vmem:[#allocation62_spill] sm:$0xff] %v3557_v5  ;;  %v3559_v2 = vld [vmem:[#allocation3 + $0x178] sm:$0xff] }
  0xbe   : > { %v1039_v10 = vsub.f32 %v3486_v37, %v4699_v13  ;;  %v3546_v13 = vld [vmem:[#allocation3 + $0x68] sm:$0xff]  ;;  %1029 = vmatprep.subr.mxu1 %v1028_v43  ;;  %v4703_v37 = vand.u32 4294901760, %v3511_v14  ;;  %v4706_v43 = vand.u32 4294901760, %v3523_v59  ;;  %796 = vmatprep.subr.mxu0 %v3533_v3  ;;  %v3567_v28 = vand.u32 4294901760, %v3535_v18 }
  0xbf   : > { %4702 = vst [vmem:[#allocation60_spill] sm:$0xff] %v3544_v33  ;;  %4704 = vst [vmem:[#allocation61_spill] sm:$0xff] %v3553_v38  ;;  %1035 = vmatpush1.msra.mxu1 %v1034_v25  ;;  %v1046_v42 = vand.u32 4294901760, %v1045_v12  ;;  %798 = vmatpush2.msra.mxu0 %v3553_v38  ;;  %v4505_v25 = vand.u32 4294901760, %v3557_v5  ;;  %v3575_v12 = vsub.f32 %v3421_v22, %v3453_v35  ;;  %v3591_v22 = vand.u32 4294901760, %v3559_v2 }
  0xc0   : > { %v1040_v57 = vand.u32 4294901760, %v1039_v10  ;;  %v1051_v19 = vsub.f32 %v3511_v14, %v4703_v37  ;;  %v1057_v10 = vsub.f32 %v3523_v59, %v4706_v43  ;;  %4707 = vst [vmem:[#allocation63_spill] sm:$0xff] %v3567_v28  ;;  %v3569_v14 = vld [vmem:[#allocation3 + $0x170] sm:$0xff]  ;;  %v3578_v43 = vand.u32 4294901760, %v3546_v13  ;;  %800 = vmatprep.subr.mxu0 %v3567_v28 }
  0xc1   : > { %4708 = vst [vmem:[#allocation64_spill] sm:$0xff] %v3575_v12  ;;  %v4710_v59 = vand.u32 4294901760, %v3544_v33  ;;  %4712 = vst [vmem:[#allocation67_spill] sm:$0xff] %v3591_v22  ;;  %v1069_v35 = vsub.f32 %v3557_v5, %v4505_v25  ;;  %v3611_v25 = vsub.f32 %v3455_v16, %v3489_v47  ;;  %v4717_v5 = vand.u32 4294901760, %v3575_v12 }
  0xc2   : > { %1041 = vmatprep.subr.mxu1 %v1040_v57  ;;  %v1052_v1 = vand.u32 4294901760, %v1051_v19  ;;  %4709 = vst [vmem:[#allocation65_spill] sm:$0xff] %v3578_v43  ;;  %v1058_v37 = vand.u32 4294901760, %v1057_v10  ;;  %v3588_v19 = vsub.f32 %v3432_v24, %v3464_v54  ;;  %802 = vmatpush2.msra.mxu0 %v3578_v43  ;;  %v3603_v10 = vand.u32 4294901760, %v3569_v14  ;;  %v3605_v24 = vld [vmem:[#allocation3 + $0xa8] sm:$0xff] }
  0xc3   : > { %1047 = vmatpush1.msra.mxu1 %v1046_v42  ;;  %v1063_v57 = vsub.f32 %v3544_v33, %v4710_v59  ;;  %v3600_v59 = vsub.f32 %v3445_v29, %v3477_v4  ;;  %804 = vmatprep.subr.mxu0 %v3591_v22  ;;  %4715 = vst [vmem:[#allocation70_spill] sm:$0xff] %v3611_v25  ;;  %v3614_v42 = vand.u32 4294901760, %v3580_v8  ;;  %v3616_v29 = vld [vmem:[#allocation3 + $0x88] sm:$0xff]  ;;  %v1070_v4 = vand.u32 4294901760, %v1069_v35 }
  0xc4   : > { %4711 = vst [vmem:[#allocation66_spill] sm:$0xff] %v3588_v19  ;;  %1053 = vmatprep.subr.mxu1 %v1052_v1  ;;  %4714 = vst [vmem:[#allocation69_spill] sm:$0xff] %v3603_v10  ;;  %v4516_v1 = vand.u32 4294901760, %v3588_v19  ;;  %v1075_v33 = vsub.f32 %v3575_v12, %v4717_v5  ;;  %806 = vmatpush2.msra.mxu0 %v3603_v10  ;;  %v3633_v35 = vand.u32 4294901760, %v3605_v24  ;;  %v3646_v47 = vand.u32 4294901760, %v3616_v29 }
  0xc5   : > { %4713 = vst [vmem:[#allocation68_spill] sm:$0xff] %v3600_v59  ;;  %1059 = vmatpush1.msra.mxu1 %v1058_v37  ;;  %v1064_v54 = vand.u32 4294901760, %v1063_v57  ;;  %4716 = vst [vmem:[#allocation71_spill] sm:$0xff] %v3614_v42  ;;  %v3625_v57 = vsub.f32 %v3466_v40, %v3500_v53  ;;  %808 = vmatprep.subr.mxu0 %v3614_v42  ;;  %v3637_v5 = vsub.f32 %v3491_v31, %v3519_v26  ;;  %v3639_v37 = vld [vmem:[#allocation3 + $0xb8] sm:$0xff] }
  0xc6   : > { %v1081_v16 = vsub.f32 %v3588_v19, %v4516_v1  ;;  %4719 = vst [vmem:[#allocation73_spill] sm:$0xff] %v3633_v35  ;;  %v1076_v40 = vand.u32 4294901760, %v1075_v33  ;;  %4722 = vst [vmem:[#allocation75_spill] sm:$0xff] %v3646_v47  ;;  %v3648_v19 = vld [vmem:[#allocation3 + $0xd0] sm:$0xff]  ;;  %v4723_v11 = vand.u32 4294901760, %v3611_v25  ;;  %810 = vmatpush2.msra.mxu0 %v3633_v35  ;;  %v3657_v33 = vsub.f32 %v3502_v20, %v3533_v3 }
  0xc7   : > { %4718 = vst [vmem:[#allocation72_spill] sm:$0xff] %v3625_v57  ;;  %1065 = vmatprep.subr.mxu1 %v1064_v54  ;;  %4720 = vst [vmem:[#allocation74_spill] sm:$0xff] %v3637_v5  ;;  %v4721_v54 = vand.u32 4294901760, %v3600_v59  ;;  %v4725_v26 = vand.u32 4294901760, %v3625_v57  ;;  %812 = vmatprep.subr.mxu0 %v3646_v47 }
  0xc8   : > { %1071 = vmatpush1.msra.mxu1 %v1070_v4  ;;  %v1082_v12 = vand.u32 4294901760, %v1081_v16  ;;  %v1093_v31 = vsub.f32 %v3611_v25, %v4723_v11  ;;  %4724 = vst [vmem:[#allocation76_spill] sm:$0xff] %v3657_v33  ;;  %v3666_v11 = vand.u32 4294901760, %v3639_v37  ;;  %v3670_v4 = vsub.f32 %v3525_v41, %v3553_v38  ;;  %v3672_v25 = vld [vmem:[#allocation3 + $0x90] sm:$0xff] }
  0xc9   : > { %v1087_v53 = vsub.f32 %v3600_v59, %v4721_v54  ;;  %v3659_v54 = vld [vmem:[#allocation3 + $0x1d8] sm:$0xff]  ;;  %1077 = vmatprep.subr.mxu1 %v1076_v40  ;;  %v1099_v16 = vsub.f32 %v3625_v57, %v4725_v26  ;;  %v4728_v40 = vand.u32 4294901760, %v3637_v5  ;;  %v3679_v26 = vand.u32 4294901760, %v3648_v19  ;;  %v3681_v57 = vld [vmem:[#allocation3 + $0x70] sm:$0xff] }
  0xca   : > { %4726 = vst [vmem:[#allocation77_spill] sm:$0xff] %v3666_v11  ;;  %4727 = vst [vmem:[#allocation78_spill] sm:$0xff] %v3670_v4  ;;  %1083 = vmatpush2.msra.mxu1 %v1082_v12  ;;  %v1094_v20 = vand.u32 4294901760, %v1093_v31  ;;  %814 = vmatpush2.msra.mxu0 %v3666_v11  ;;  %v4539_v41 = vand.u32 4294901760, %v3670_v4  ;;  %v3687_v12 = vsub.f32 %v3535_v18, %v3567_v28  ;;  %v3690_v31 = vand.u32 4294901760, %v3659_v54 }
  0xcb   : > { %v1088_v1 = vand.u32 4294901760, %v1087_v53  ;;  %v1105_v53 = vsub.f32 %v3637_v5, %v4728_v40  ;;  %4729 = vst [vmem:[#allocation79_spill] sm:$0xff] %v3679_v26  ;;  %v1100_v59 = vand.u32 4294901760, %v1099_v16  ;;  %v3692_v40 = vld [vmem:[#allocation3 + $0x78] sm:$0xff]  ;;  %v4732_v38 = vand.u32 4294901760, %v3657_v33  ;;  %816 = vmatprep.subr.mxu0 %v3679_v26 }
  0xcc   : > { %4730 = vst [vmem:[#allocation80_spill] sm:$0xff] %v3687_v12  ;;  %4731 = vst [vmem:[#allocation81_spill] sm:$0xff] %v3690_v31  ;;  %v3700_v16 = vsub.f32 %v3546_v13, %v3578_v43  ;;  %v3703_v18 = vand.u32 4294901760, %v3672_v25  ;;  %v1117_v28 = vsub.f32 %v3670_v4, %v4539_v41  ;;  %818 = vmatpush2.msra.mxu0 %v3690_v31  ;;  %v3717_v13 = vld [vmem:[#allocation3 + $0xe8] sm:$0xff]  ;;  %v4739_v4 = vand.u32 4294901760, %v3687_v12 }
  0xcd   : > { %1089 = vmatprep.subr.mxu1 %v1088_v1  ;;  %v1106_v3 = vand.u32 4294901760, %v1105_v53  ;;  %v1111_v1 = vsub.f32 %v3657_v33, %v4732_v38  ;;  %v3712_v38 = vsub.f32 %v3559_v2, %v3591_v22  ;;  %v3715_v53 = vand.u32 4294901760, %v3681_v57  ;;  %v3728_v2 = vld [vmem:[#allocation3 + $0x1f0] sm:$0xff] }
  0xce   : > { %1095 = vmatpush2.msra.mxu1 %v1094_v20  ;;  %4733 = vst [vmem:[#allocation82_spill] sm:$0xff] %v3700_v16  ;;  %4734 = vst [vmem:[#allocation83_spill] sm:$0xff] %v3703_v18  ;;  %820 = vmatprep.subr.mxu0 %v3703_v18  ;;  %v3723_v41 = vsub.f32 %v3569_v14, %v3603_v10  ;;  %v3726_v20 = vand.u32 4294901760, %v3692_v40  ;;  %v1118_v22 = vand.u32 4294901760, %v1117_v28  ;;  %v3745_v28 = vand.u32 4294901760, %v3717_v13 }
  0xcf   : > { %1101 = vmatprep.subr.mxu1 %v1100_v59  ;;  %4735 = vst [vmem:[#allocation84_spill] sm:$0xff] %v3712_v38  ;;  %4736 = vst [vmem:[#allocation85_spill] sm:$0xff] %v3715_v53  ;;  %v1112_v43 = vand.u32 4294901760, %v1111_v1  ;;  %v4550_v59 = vand.u32 4294901760, %v3700_v16  ;;  %v1123_v33 = vsub.f32 %v3687_v12, %v4739_v4  ;;  %822 = vmatpush2.msra.mxu0 %v3715_v53  ;;  %v3758_v10 = vand.u32 4294901760, %v3728_v2 }
  0xd0   : > { %1107 = vmatpush2.msra.mxu1 %v1106_v3  ;;  %4737 = vst [vmem:[#allocation86_spill] sm:$0xff] %v3723_v41  ;;  %4738 = vst [vmem:[#allocation87_spill] sm:$0xff] %v3726_v20  ;;  %v3737_v1 = vsub.f32 %v3580_v8, %v3614_v42  ;;  %824 = vmatprep.subr.mxu0 %v3726_v20  ;;  %v3749_v4 = vsub.f32 %v3605_v24, %v3633_v35  ;;  %v3751_v3 = vld [vmem:[#allocation3 + $0x1a0] sm:$0xff]  ;;  %v4745_v5 = vand.u32 4294901760, %v3723_v41 }
  0xd1   : > { %1113 = vmatprep.subr.mxu1 %v1112_v43  ;;  %v1129_v14 = vsub.f32 %v3700_v16, %v4550_v59  ;;  %4741 = vst [vmem:[#allocation89_spill] sm:$0xff] %v3745_v28  ;;  %v1124_v8 = vand.u32 4294901760, %v1123_v33  ;;  %v4743_v43 = vand.u32 4294901760, %v3712_v38  ;;  %4744 = vst [vmem:[#allocation91_spill] sm:$0xff] %v3758_v10  ;;  %v3760_v16 = vld [vmem:[#allocation3 + $0x128] sm:$0xff]  ;;  %826 = vmatpush2.msra.mxu0 %v3745_v28 }
  0xd2   : > { %4740 = vst [vmem:[#allocation88_spill] sm:$0xff] %v3737_v1  ;;  %4742 = vst [vmem:[#allocation90_spill] sm:$0xff] %v3749_v4  ;;  %1119 = vmatpush2.msra.mxu1 %v1118_v22  ;;  %v1141_v24 = vsub.f32 %v3723_v41, %v4745_v5  ;;  %v3769_v33 = vsub.f32 %v3616_v29, %v3646_v47  ;;  %v4747_v35 = vand.u32 4294901760, %v3737_v1  ;;  %828 = vmatprep.subr.mxu0 %v3758_v10  ;;  %v3784_v41 = vld [vmem:[#allocation3 + $0x1f8] sm:$0xff] }
  0xd3   : > { %v1135_v42 = vsub.f32 %v3712_v38, %v4743_v43  ;;  %v1130_v12 = vand.u32 4294901760, %v1129_v14  ;;  %v3771_v43 = vld [vmem:[#allocation3 + $0x20] sm:$0xff]  ;;  %1125 = vmatprep.subr.mxu1 %v1124_v8  ;;  %v3778_v5 = vand.u32 4294901760, %v3751_v3  ;;  %v3782_v22 = vsub.f32 %v3639_v37, %v3666_v11 }
  0xd4   : > { %4746 = vst [vmem:[#allocation92_spill] sm:$0xff] %v3769_v33  ;;  %v1147_v14 = vsub.f32 %v3737_v1, %v4747_v35  ;;  %v1142_v29 = vand.u32 4294901760, %v1141_v24  ;;  %v4750_v8 = vand.u32 4294901760, %v3749_v4  ;;  %v3791_v35 = vand.u32 4294901760, %v3760_v16  ;;  %v3793_v1 = vld [vmem:[#allocation3 + $0x40] sm:$0xff] }
  0xd5   : > { %v1136_v59 = vand.u32 4294901760, %v1135_v42  ;;  %4748 = vst [vmem:[#allocation93_spill] sm:$0xff] %v3778_v5  ;;  %4749 = vst [vmem:[#allocation94_spill] sm:$0xff] %v3782_v22  ;;  %1131 = vmatpush2.msra.mxu1 %v1130_v12  ;;  %830 = vmatpush2.msra.mxu0 %v3778_v5  ;;  %v4573_v37 = vand.u32 4294901760, %v3782_v22  ;;  %v3799_v12 = vsub.f32 %v3648_v19, %v3679_v26  ;;  %v3802_v24 = vand.u32 4294901760, %v3771_v43 }
  0xd6   : > { %v1153_v42 = vsub.f32 %v3749_v4, %v4750_v8  ;;  %4751 = vst [vmem:[#allocation95_spill] sm:$0xff] %v3791_v35  ;;  %v1148_v38 = vand.u32 4294901760, %v1147_v14  ;;  %v3804_v8 = vld [vmem:[#allocation3 + $0xc8] sm:$0xff]  ;;  %v4753_v11 = vand.u32 4294901760, %v3769_v33  ;;  %832 = vmatprep.subr.mxu0 %v3791_v35  ;;  %v3812_v14 = vsub.f32 %v3659_v54, %v3690_v31  ;;  %v3829_v54 = vld [vmem:[#allocation3 + $0x100] sm:$0xff] }
  0xd7   : > { %1137 = vmatprep.subr.mxu1 %v1136_v59  ;;  %4752 = vst [vmem:[#allocation96_spill] sm:$0xff] %v3799_v12  ;;  %v3815_v19 = vand.u32 4294901760, %v3784_v41  ;;  %v1165_v26 = vsub.f32 %v3782_v22, %v4573_v37  ;;  %834 = vmatpush2.msra.mxu0 %v3802_v24  ;;  %v3835_v37 = vsub.f32 %v3681_v57, %v3715_v53  ;;  %v4760_v22 = vand.u32 4294901760, %v3799_v12  ;;  %v3863_v53 = vld [vmem:[#allocation3 + $0x148] sm:$0xff] }
  0xd8   : > { %1143 = vmatpush2.msra.mxu1 %v1142_v29  ;;  %v1154_v47 = vand.u32 4294901760, %v1153_v42  ;;  %v1159_v59 = vsub.f32 %v3769_v33, %v4753_v11  ;;  %4754 = vst [vmem:[#allocation97_spill] sm:$0xff] %v3812_v14  ;;  %v3824_v11 = vsub.f32 %v3672_v25, %v3703_v18  ;;  %v3827_v42 = vand.u32 4294901760, %v3793_v1  ;;  %v3840_v25 = vld [vmem:[#allocation3 + $0x1d0] sm:$0xff] }
  0xd9   : > { %4755 = vst [vmem:[#allocation98_spill] sm:$0xff] %v3815_v19  ;;  %1149 = vmatprep.subr.mxu1 %v1148_v38  ;;  %v4582_v38 = vand.u32 4294901760, %v3812_v14  ;;  %836 = vmatprep.subr.mxu0 %v3815_v19  ;;  %4758 = vst [vmem:[#allocation101_spill] sm:$0xff] %v3835_v37  ;;  %v3838_v29 = vand.u32 4294901760, %v3804_v8  ;;  %v1166_v18 = vand.u32 4294901760, %v1165_v26  ;;  %v1171_v33 = vsub.f32 %v3799_v12, %v4760_v22 }
  0xda   : > { %4756 = vst [vmem:[#allocation99_spill] sm:$0xff] %v3824_v11  ;;  %4757 = vst [vmem:[#allocation100_spill] sm:$0xff] %v3827_v42  ;;  %1155 = vmatpush2.msra.mxu1 %v1154_v47  ;;  %v1160_v31 = vand.u32 4294901760, %v1159_v59  ;;  %838 = vmatpush2.msra.mxu0 %v3827_v42  ;;  %v3849_v59 = vsub.f32 %v3692_v40, %v3726_v20  ;;  %v3857_v22 = vand.u32 4294901760, %v3829_v54  ;;  %v4763_v40 = vand.u32 4294901760, %v3824_v11 }
  0xdb   : > { %4759 = vst [vmem:[#allocation102_spill] sm:$0xff] %v3838_v29  ;;  %v1177_v57 = vsub.f32 %v3812_v14, %v4582_v38  ;;  %840 = vmatprep.subr.mxu0 %v3838_v29  ;;  %v3861_v47 = vsub.f32 %v3717_v13, %v3745_v28  ;;  %v3870_v20 = vand.u32 4294901760, %v3840_v25  ;;  %v652_v14 = vld [vmem:[%s2888_s1 + $0x8] sm:$0xff]  ;;  %v4764_v4 = vand.u32 4294901760, %v3835_v37 }
  0xdc   : > { %4761 = vst [vmem:[#allocation103_spill] sm:$0xff] %v3849_v59  ;;  %1161 = vmatprep.subr.mxu1 %v1160_v31  ;;  %v1172_v31 = vand.u32 4294901760, %v1171_v33  ;;  %v1183_v38 = vsub.f32 %v3824_v11, %v4763_v40  ;;  %842 = vmatpush2.msra.mxu0 %v3857_v22  ;;  %v3880_v33 = vsub.f32 %v3728_v2, %v3758_v10  ;;  %v651_v40 = vld [vmem:[%s2888_s1] sm:$0xff]  ;;  %v4765_v28 = vand.u32 4294901760, %v3849_v59 }
  0xdd   : > { %4762 = vst [vmem:[#allocation104_spill] sm:$0xff] %v3861_v47  ;;  %1167 = vmatpush2.msra.mxu1 %v1166_v18  ;;  %v1178_v12 = vand.u32 4294901760, %v1177_v57  ;;  %v1189_v13 = vsub.f32 %v3835_v37, %v4764_v4  ;;  %844 = vmatprep.subr.mxu0 %v3870_v20  ;;  %v3888_v57 = vand.u32 4294901760, %v3863_v53  ;;  %v3892_v4 = vsub.f32 %v3751_v3, %v3778_v5 }
  0xde   : > { %1173 = vmatprep.subr.mxu1 %v1172_v31  ;;  %v1184_v26 = vand.u32 4294901760, %v1183_v38  ;;  %v1195_v11 = vsub.f32 %v3849_v59, %v4765_v28  ;;  %v4767_v2 = vand.u32 4294901760, %v3861_v47  ;;  %v4602_v38 = vand.u32 4294901760, %v3880_v33 }
  0xdf   : > { %4766 = vst [vmem:[#allocation105_spill] sm:$0xff] %v3892_v4  ;;  %1179 = vmatpush2.msra.mxu1 %v1178_v12  ;;  %v1190_v18 = vand.u32 4294901760, %v1189_v13  ;;  %v3898_v10 = vand.u32 4294901760, %v652_v14  ;;  %846 = vmatpush2.msra.mxu0 %v3888_v57  ;;  %v4601_v59 = vand.u32 4294901760, %v3892_v4  ;;  %v3904_v3 = vsub.f32 %v3760_v16, %v3791_v35 }
  0xe0   : > { %v1201_v31 = vsub.f32 %v3861_v47, %v4767_v2  ;;  %1185 = vmatprep.subr.mxu1 %v1184_v26  ;;  %v1196_v28 = vand.u32 4294901760, %v1195_v11  ;;  %v3906_v12 = vand.u32 4294901760, %v651_v40  ;;  %v1207_v2 = vsub.f32 %v3880_v33, %v4602_v38  ;;  %1283 = vmatprep.subr.mxu0 %v3128_v63 }
  0xe1   : > { %4768 = vst [vmem:[#allocation106_spill] sm:$0xff] %v3898_v10  ;;  %1191 = vmatpush2.msra.mxu1 %v1190_v18  ;;  %v3912_v5 = vsub.f32 %v652_v14, %v3898_v10  ;;  %v3917_v11 = vsub.f32 %v3771_v43, %v3802_v24  ;;  %v1213_v16 = vsub.f32 %v3892_v4, %v4601_v59  ;;  %v4605_v26 = vand.u32 4294901760, %v3904_v3 }
  0xe2   : > { %4769 = vst [vmem:[#allocation107_spill] sm:$0xff] %v3906_v12  ;;  %v1202_v13 = vand.u32 4294901760, %v1201_v31  ;;  %1197 = vmatprep.subr.mxu1 %v1196_v28  ;;  %v3924_v18 = vsub.f32 %v651_v40, %v3906_v12  ;;  %v3928_v14 = vsub.f32 %v3784_v41, %v3815_v19  ;;  %1265 = vmatprep.mubr.f32.mxu1 %v3898_v10  ;;  %v1208_v31 = vand.u32 4294901760, %v1207_v2 }
  0xe3   : > { %4770 = vst [vmem:[#allocation108_spill] sm:$0xff] %v3917_v11  ;;  %v4606_v43 = vand.u32 4294901760, %v3912_v5  ;;  %v4609_v28 = vand.u32 4294901760, %v3917_v11  ;;  %v3935_v59 = vsub.f32 %v3793_v1, %v3827_v42  ;;  %v1214_v38 = vand.u32 4294901760, %v1213_v16 }
  0xe4   : > { %1203 = vmatpush2.msra.mxu1 %v1202_v13  ;;  %v1219_v40 = vsub.f32 %v3904_v3, %v4605_v26  ;;  %v4614_v41 = vand.u32 4294901760, %v3924_v18  ;;  %v4615_v19 = vand.u32 4294901760, %v3928_v14  ;;  %v3951_v16 = vsub.f32 %v3804_v8, %v3838_v29 }
  0xe5   : > { %1209 = vmatprep.subr.mxu1 %v1208_v31  ;;  %v850_v13 = vsub.f32 %v3912_v5, %v4606_v43  ;;  %v1225_v2 = vsub.f32 %v3917_v11, %v4609_v28  ;;  %v3961_v10 = vsub.f32 %v3829_v54, %v3857_v22  ;;  %v4771_v42 = vand.u32 4294901760, %v3935_v59 }
  0xe6   : > { %1215 = vmatpush2.msra.mxu1 %v1214_v38  ;;  %v1220_v26 = vand.u32 4294901760, %v1219_v40  ;;  %v856_v31 = vsub.f32 %v3924_v18, %v4614_v41  ;;  %v1231_v43 = vsub.f32 %v3928_v14, %v4615_v19  ;;  %v4619_v38 = vand.u32 4294901760, %v3951_v16 }
  0xe7   : > { %v851_v28 = vand.u32 4294901760, %v850_v13  ;;  %v1226_v1 = vand.u32 4294901760, %v1225_v2  ;;  %v1237_v8 = vsub.f32 %v3935_v59, %v4771_v42  ;;  %v4618_v41 = vand.u32 4294901760, %v3961_v10 }
  0xe8   : > { %1221 = vmatprep.subr.mxu1 %v1220_v26  ;;  %v857_v40 = vand.u32 4294901760, %v856_v31  ;;  %v1232_v29 = vand.u32 4294901760, %v1231_v43  ;;  %v3970_v19 = vsub.f32 %v3840_v25, %v3870_v20  ;;  %v1243_v13 = vsub.f32 %v3951_v16, %v4619_v38  ;;  %v4788_v38 = vld [vmem:[#allocation27_spill] sm:$0xff] }
  0xe9   : > { %852 = vmatprep.mubr.f32.mxu0 %v851_v28  ;;  %1227 = vmatpush2.msra.mxu1 %v1226_v1  ;;  %v1238_v54 = vand.u32 4294901760, %v1237_v8  ;;  %v3977_v42 = vsub.f32 %v3863_v53, %v3888_v57  ;;  %v1249_v26 = vsub.f32 %v3961_v10, %v4618_v41  ;;  %v4774_v8 = vld [vmem:[#allocation20_spill] sm:$0xff]  ;;  %v4787_v41 = vld [vmem:[#allocation50_spill] sm:$0xff] }
  0xea   : > { %4772 = vst [vmem:[#allocation109_spill] sm:$0xff] %v3970_v19  ;;  %858 = vmatmul.mubr.f32.vlgmr.msra.gmra.mxu0 %v857_v40  ;;  %1233 = vmatprep.subr.mxu1 %v1232_v29  ;;  %v4617_v25 = vand.u32 4294901760, %v3970_v19  ;;  %v1244_v43 = vand.u32 4294901760, %v1243_v13  ;;  %v4775_v40 = vld [vmem:[#allocation38_spill] sm:$0xff]  ;;  %v4777_v13 = vld [vmem:[#allocation40_spill] sm:$0xff] }
  0xeb   : > { %4773 = vst [vmem:[#allocation110_spill] sm:$0xff] %v3977_v42  ;;  %1286 = vmatpush1.msra.mxu0 %v3141_v7  ;;  %1239 = vmatpush2.msra.mxu1 %v1238_v54  ;;  %v4616_v28 = vand.u32 4294901760, %v3977_v42  ;;  %v1250_v2 = vand.u32 4294901760, %v1249_v26  ;;  %v4776_v54 = vld [vmem:[#allocation21_spill] sm:$0xff]  ;;  %v4778_v26 = vld [vmem:[#allocation22_spill] sm:$0xff] }
  0xec   : > { %1289 = vmatprep.subr.mxu0 %v3147_v9  ;;  %v1255_v53 = vsub.f32 %v3970_v19, %v4617_v25  ;;  %1245 = vmatprep.subr.mxu1 %v1244_v43  ;;  %v4779_v43 = vld [vmem:[#allocation42_spill] sm:$0xff] }
  0xed   : > { %1292 = vmatpush1.msra.mxu0 %v3161_v17  ;;  %v1261_v29 = vsub.f32 %v3977_v42, %v4616_v28  ;;  %1251 = vmatpush2.msra.mxu1 %v1250_v2  ;;  %v4780_v2 = vld [vmem:[#allocation23_spill] sm:$0xff]  ;;  %v4785_v28 = vld [vmem:[#allocation48_spill] sm:$0xff]  ;;  %v4786_v25 = vld [vmem:[#allocation26_spill] sm:$0xff] }
  0xee   : > { %1295 = vmatprep.subr.mxu0 %v3170_v21  ;;  %v1256_v1 = vand.u32 4294901760, %v1255_v53  ;;  %v4781_v53 = vld [vmem:[#allocation44_spill] sm:$0xff] }
  0xef   : > { %1298 = vmatpush1.msra.mxu0 %v3183_v27  ;;  %v1262_v31 = vand.u32 4294901760, %v1261_v29  ;;  %v4782_v29 = vld [vmem:[#allocation24_spill] sm:$0xff] }
  0xf0   : > { %1257 = vmatprep.subr.mxu1 %v1256_v1  ;;  %1301 = vmatprep.subr.mxu0 %v3197_v32  ;;  %v4783_v1 = vld [vmem:[#allocation46_spill] sm:$0xff] }
  0xf1   : > { %1263 = vmatpush2.msra.mxu1 %v1262_v31  ;;  %1304 = vmatpush1.msra.mxu0 %v3223_v45  ;;  %v4784_v31 = vld [vmem:[#allocation25_spill] sm:$0xff] }
  0xf2   : > { %1267 = vmatmul.mubr.f32.vlgmr.msra.gmra.mxu1 %v3906_v12  ;;  %1307 = vmatprep.subr.mxu0 %v3235_v50  ;;  %v4789_v12 = vld [vmem:[#allocation52_spill] sm:$0xff] }
  0xf3   : > { %1495 = vmatprep.subr.mxu1 %v3108_v51  ;;  %1310 = vmatpush1.msra.mxu0 %v3246_v58 }
  0xf4   : > { %1497 = vmatpush1.msra.mxu1 %v3110_v52  ;;  %1313 = vmatprep.subr.mxu0 %v3257_v34 }
  0xf5   : > { %1499 = vmatprep.subr.mxu1 %v3112_v15  ;;  %1316 = vmatpush1.msra.mxu0 %v3269_v39 }
  0xf6   : > { %1501 = vmatpush1.msra.mxu1 %v3114_v55  ;;  %1319 = vmatprep.subr.mxu0 %v3283_v48 }
  0xf7   : > { %1503 = vmatprep.subr.mxu1 %v3116_v23  ;;  %1322 = vmatpush1.msra.mxu0 %v3295_v30 }
  0xf8   : > { %1505 = vmatpush1.msra.mxu1 %v3118_v56  ;;  %1325 = vmatprep.subr.mxu0 %v3316_v44 }
  0xf9   : > { %1507 = vmatprep.subr.mxu1 %v3121_v60  ;;  %1328 = vmatpush1.msra.mxu0 %v3329_v0 }
  0xfa   : > { %1509 = vmatpush1.msra.mxu1 %v3123_v61  ;;  %1331 = vmatprep.subr.mxu0 %v3347_v36 }
  0xfb   : > { %1511 = vmatprep.subr.mxu1 %v3125_v62  ;;  %1334 = vmatpush1.msra.mxu0 %v3360_v49 }
  0xfc   : > { %1513 = vmatpush1.msra.mxu1 %v3138_v6  ;;  %1337 = vmatprep.subr.mxu0 %v3372_v46 }
  0xfd   : > { %1515 = vmatprep.subr.mxu1 %v4774_v8  ;;  %1340 = vmatpush1.msra.mxu0 %v4775_v40  ;;  %v4837_v40 = vld [vmem:[#allocation65_spill] sm:$0xff] }
  0xfe   : > { %1517 = vmatpush1.msra.mxu1 %v4776_v54  ;;  %1343 = vmatprep.subr.mxu0 %v4777_v13  ;;  %v4823_v13 = vld [vmem:[#allocation51_spill] sm:$0xff] }
  0xff   : > { %1519 = vmatprep.subr.mxu1 %v4778_v26  ;;  %1346 = vmatpush1.msra.mxu0 %v4779_v43  ;;  %v4790_v43 = vld [vmem:[#allocation28_spill] sm:$0xff]  ;;  %v4814_v26 = vld [vmem:[#allocation43_spill] sm:$0xff] }
 0x100   : > { %1521 = vmatpush1.msra.mxu1 %v4780_v2  ;;  %1349 = vmatprep.subr.mxu0 %v4781_v53  ;;  %v4791_v2 = vld [vmem:[#allocation54_spill] sm:$0xff]  ;;  %v4792_v53 = vld [vmem:[#allocation29_spill] sm:$0xff] }
 0x101   : > { %1523 = vmatprep.subr.mxu1 %v4782_v29  ;;  %1352 = vmatpush1.msra.mxu0 %v4783_v1  ;;  %v4793_v29 = vld [vmem:[#allocation56_spill] sm:$0xff]  ;;  %v4794_v1 = vld [vmem:[#allocation30_spill] sm:$0xff] }
 0x102   : > { %1525 = vmatpush1.msra.mxu1 %v4784_v31  ;;  %1355 = vmatprep.subr.mxu0 %v4785_v28  ;;  %v4795_v31 = vld [vmem:[#allocation58_spill] sm:$0xff]  ;;  %v654_v28 = vld [vmem:[%s2888_s1 + $0x18] sm:$0xff] }
 0x103   : > { %1527 = vmatprep.subr.mxu1 %v4786_v25  ;;  %1358 = vmatpush1.msra.mxu0 %v4787_v41  ;;  %v4796_v25 = vld [vmem:[#allocation31_spill] sm:$0xff]  ;;  %v4797_v41 = vld [vmem:[#allocation60_spill] sm:$0xff] }
 0x104   : > { %1529 = vmatpush1.msra.mxu1 %v4788_v38  ;;  %1361 = vmatprep.subr.mxu0 %v4789_v12  ;;  %v4798_v38 = vld [vmem:[#allocation32_spill] sm:$0xff]  ;;  %v4799_v12 = vld [vmem:[#allocation62_spill] sm:$0xff] }
 0x105   : > { %1531 = vmatprep.subr.mxu1 %v4790_v43  ;;  %1364 = vmatpush1.msra.mxu0 %v4791_v2  ;;  %v4800_v43 = vld [vmem:[#allocation33_spill] sm:$0xff]  ;;  %v4801_v2 = vld [vmem:[#allocation64_spill] sm:$0xff] }
 0x106   : > { %1533 = vmatpush1.msra.mxu1 %v4792_v53  ;;  %1367 = vmatprep.subr.mxu0 %v4793_v29  ;;  %v4802_v53 = vld [vmem:[#allocation34_spill] sm:$0xff] }
 0x107   : > { %1535 = vmatprep.subr.mxu1 %v4794_v1  ;;  %1370 = vmatpush1.msra.mxu0 %v4795_v31  ;;  %v4803_v29 = vld [vmem:[#allocation66_spill] sm:$0xff]  ;;  %v4804_v1 = vld [vmem:[#allocation35_spill] sm:$0xff]  ;;  %v4805_v31 = vld [vmem:[#allocation68_spill] sm:$0xff] }
 0x108   : > { %1537 = vmatpush1.msra.mxu1 %v4796_v25  ;;  %1373 = vmatprep.subr.mxu0 %v4797_v41  ;;  %v4806_v25 = vld [vmem:[#allocation36_spill] sm:$0xff]  ;;  %v4807_v41 = vld [vmem:[#allocation70_spill] sm:$0xff] }
 0x109   : > { %1539 = vmatprep.subr.mxu1 %v4798_v38  ;;  %1376 = vmatpush1.msra.mxu0 %v4799_v12  ;;  %v4808_v38 = vld [vmem:[#allocation37_spill] sm:$0xff]  ;;  %v4809_v12 = vld [vmem:[#allocation72_spill] sm:$0xff] }
 0x10a   : > { %1541 = vmatpush1.msra.mxu1 %v4800_v43  ;;  %1379 = vmatprep.subr.mxu0 %v4801_v2  ;;  %v4810_v43 = vld [vmem:[#allocation39_spill] sm:$0xff]  ;;  %v4811_v2 = vld [vmem:[#allocation74_spill] sm:$0xff] }
 0x10b   : > { %1543 = vmatprep.subr.mxu1 %v4802_v53  ;;  %1382 = vmatpush2.msra.mxu0 %v4803_v29  ;;  %v4812_v53 = vld [vmem:[#allocation41_spill] sm:$0xff]  ;;  %v4813_v29 = vld [vmem:[#allocation76_spill] sm:$0xff] }
 0x10c   : > { %1545 = vmatpush1.msra.mxu1 %v4804_v1  ;;  %1385 = vmatprep.subr.mxu0 %v4805_v31  ;;  %v653_v1 = vld [vmem:[%s2888_s1 + $0x10] sm:$0xff]  ;;  %v4815_v31 = vld [vmem:[#allocation78_spill] sm:$0xff] }
 0x10d   : > { %1547 = vmatprep.subr.mxu1 %v4806_v25  ;;  %1388 = vmatpush2.msra.mxu0 %v4807_v41  ;;  %v4063_v25 = vand.u32 4294901760, %v654_v28  ;;  %v4817_v41 = vld [vmem:[#allocation45_spill] sm:$0xff] }
 0x10e   : > { %1549 = vmatpush1.msra.mxu1 %v4808_v38  ;;  %1391 = vmatprep.subr.mxu0 %v4809_v12  ;;  %v4818_v38 = vld [vmem:[#allocation80_spill] sm:$0xff]  ;;  %v4819_v12 = vld [vmem:[#allocation47_spill] sm:$0xff] }
 0x10f   : > { %1551 = vmatprep.subr.mxu1 %v4810_v43  ;;  %1394 = vmatpush2.msra.mxu0 %v4811_v2  ;;  %4816 = vst [vmem:[#allocation20_spill] sm:$0xff] %v4063_v25  ;;  %v4820_v43 = vld [vmem:[#allocation82_spill] sm:$0xff]  ;;  %v4069_v2 = vand.u32 4294901760, %v653_v1 }
 0x110   : > { %1553 = vmatpush1.msra.mxu1 %v4812_v53  ;;  %1397 = vmatprep.subr.mxu0 %v4813_v29  ;;  %v4821_v53 = vld [vmem:[#allocation49_spill] sm:$0xff]  ;;  %v4822_v29 = vld [vmem:[#allocation84_spill] sm:$0xff] }
 0x111   : > { %1555 = vmatprep.subr.mxu1 %v4814_v26  ;;  %1400 = vmatpush2.msra.mxu0 %v4815_v31  ;;  %v4824_v26 = vld [vmem:[#allocation86_spill] sm:$0xff]  ;;  %v4076_v31 = vsub.f32 %v654_v28, %v4063_v25  ;;  %v4083_v54 = vsub.f32 %v653_v1, %v4069_v2 }
 0x112   : > { %1557 = vmatpush1.msra.mxu1 %v4817_v41  ;;  %1403 = vmatprep.subr.mxu0 %v4818_v38  ;;  %v4825_v41 = vld [vmem:[#allocation53_spill] sm:$0xff]  ;;  %v4826_v38 = vld [vmem:[#allocation88_spill] sm:$0xff] }
 0x113   : > { %1559 = vmatprep.subr.mxu1 %v4819_v12  ;;  %1406 = vmatpush2.msra.mxu0 %v4820_v43  ;;  %v4827_v12 = vld [vmem:[#allocation55_spill] sm:$0xff]  ;;  %v4828_v43 = vld [vmem:[#allocation90_spill] sm:$0xff]  ;;  %v4623_v28 = vand.u32 4294901760, %v4076_v31  ;;  %v4625_v1 = vand.u32 4294901760, %v4083_v54 }
 0x114   : > { %1561 = vmatpush2.msra.mxu1 %v4821_v53  ;;  %1409 = vmatprep.subr.mxu0 %v4822_v29  ;;  %v4829_v53 = vld [vmem:[#allocation57_spill] sm:$0xff]  ;;  %v4830_v29 = vld [vmem:[#allocation92_spill] sm:$0xff] }
 0x115   : > { %1563 = vmatprep.subr.mxu1 %v4823_v13  ;;  %1412 = vmatpush2.msra.mxu0 %v4824_v26  ;;  %v4831_v13 = vld [vmem:[#allocation59_spill] sm:$0xff]  ;;  %v4832_v26 = vld [vmem:[#allocation94_spill] sm:$0xff] }
 0x116   : > { %1565 = vmatpush2.msra.mxu1 %v4825_v41  ;;  %1415 = vmatprep.subr.mxu0 %v4826_v38  ;;  %v4833_v41 = vld [vmem:[#allocation61_spill] sm:$0xff]  ;;  %v4834_v38 = vld [vmem:[#allocation96_spill] sm:$0xff] }
 0x117   : > { %1567 = vmatprep.subr.mxu1 %v4827_v12  ;;  %1418 = vmatpush2.msra.mxu0 %v4828_v43  ;;  %v4835_v12 = vld [vmem:[#allocation63_spill] sm:$0xff]  ;;  %v4836_v43 = vld [vmem:[#allocation97_spill] sm:$0xff] }
 0x118   : > { %1569 = vmatpush2.msra.mxu1 %v4829_v53  ;;  %1421 = vmatprep.subr.mxu0 %v4830_v29  ;;  %v4838_v53 = vld [vmem:[#allocation99_spill] sm:$0xff] }
 0x119   : > { %1571 = vmatprep.subr.mxu1 %v4831_v13  ;;  %1424 = vmatpush2.msra.mxu0 %v4832_v26  ;;  %v4839_v29 = vld [vmem:[#allocation67_spill] sm:$0xff]  ;;  %v4840_v26 = vld [vmem:[#allocation69_spill] sm:$0xff] }
 0x11a   : > { %1573 = vmatpush2.msra.mxu1 %v4833_v41  ;;  %1427 = vmatprep.subr.mxu0 %v4834_v38  ;;  %v866_v41 = vsub.f32 %v4076_v31, %v4623_v28  ;;  %v4841_v38 = vld [vmem:[#allocation103_spill] sm:$0xff] }
 0x11b   : > { %1575 = vmatprep.subr.mxu1 %v4835_v12  ;;  %1430 = vmatpush2.msra.mxu0 %v4836_v43  ;;  %v4842_v12 = vld [vmem:[#allocation71_spill] sm:$0xff] }
 0x11c   : > { %1577 = vmatpush2.msra.mxu1 %v4837_v40  ;;  %1433 = vmatprep.subr.mxu0 %v4838_v53  ;;  %v872_v53 = vsub.f32 %v4083_v54, %v4625_v1  ;;  %v4843_v40 = vld [vmem:[#allocation73_spill] sm:$0xff]  ;;  %v867_v28 = vand.u32 4294901760, %v866_v41  ;;  %v4848_v1 = vld [vmem:[#allocation83_spill] sm:$0xff] }
 0x11d   : > { %1579 = vmatprep.subr.mxu1 %v4839_v29  ;;  %1436 = vmatpush2.msra.mxu0 %v3835_v37  ;;  %v4844_v37 = vld [vmem:[#allocation75_spill] sm:$0xff] }
 0x11e   : > { %1581 = vmatpush2.msra.mxu1 %v4840_v26  ;;  %1439 = vmatprep.subr.mxu0 %v4841_v38  ;;  %v4845_v26 = vld [vmem:[#allocation77_spill] sm:$0xff]  ;;  %v4850_v41 = vld [vmem:[#allocation87_spill] sm:$0xff] }
 0x11f   : > { %1583 = vmatprep.subr.mxu1 %v4842_v12  ;;  %1442 = vmatpush2.msra.mxu0 %v3861_v47  ;;  %v4846_v12 = vld [vmem:[#allocation79_spill] sm:$0xff]  ;;  %v873_v47 = vand.u32 4294901760, %v872_v53  ;;  %v4847_v38 = vld [vmem:[#allocation81_spill] sm:$0xff] }
 0x120   : > { %1585 = vmatpush2.msra.mxu1 %v4843_v40  ;;  %1445 = vmatprep.subr.mxu0 %v3880_v33  ;;  %v4852_v53 = vld [vmem:[#allocation91_spill] sm:$0xff] }
 0x121   : > { %1587 = vmatprep.subr.mxu1 %v4844_v37  ;;  %1448 = vmatpush2.msra.mxu0 %v3892_v4  ;;  %v4849_v4 = vld [vmem:[#allocation85_spill] sm:$0xff] }
 0x122   : > { %1589 = vmatpush2.msra.mxu1 %v4845_v26  ;;  %1451 = vmatprep.subr.mxu0 %v3904_v3 }
 0x123   : > { %1591 = vmatprep.subr.mxu1 %v4846_v12  ;;  %1454 = vmatpush2.msra.mxu0 %v3917_v11  ;;  %v4851_v11 = vld [vmem:[#allocation89_spill] sm:$0xff] }
 0x124   : > { %1593 = vmatpush2.msra.mxu1 %v4847_v38  ;;  %1457 = vmatprep.subr.mxu0 %v3928_v14 }
 0x125   : > { %1595 = vmatprep.subr.mxu1 %v4848_v1  ;;  %868 = vmatprep.mubr.f32.mxu0 %v867_v28  ;;  %v4853_v28 = vld [vmem:[#allocation93_spill] sm:$0xff] }
 0x126   : > { %1460 = vmatpush2.msra.mxu0 %v3935_v59  ;;  %1597 = vmatpush2.msra.mxu1 %v4849_v4 }
 0x127   : > { %874 = vmatmul.mubr.f32.gmra.mxu0 %v873_v47  ;;  %1463 = vmatprep.subr.mxu0 %v3951_v16  ;;  %v4854_v47 = vand.u32 4294901760, %v3128_v63  ;;  %v4860_v63 = vld [vmem:[#allocation102_spill] sm:$0xff] }
 0x128   : > { %1599 = vmatprep.subr.mxu1 %v4850_v41  ;;  %1466 = vmatpush2.msra.mxu0 %v3961_v10 }
 0x129   : > { %1601 = vmatpush2.msra.mxu1 %v4851_v11  ;;  %1469 = vmatprep.subr.mxu0 %v3970_v19  ;;  %v4855_v19 = vand.u32 4294901760, %v3141_v7  ;;  %v4861_v7 = vand.u32 4294901760, %v3170_v21  ;;  %v4866_v21 = vand.u32 4294901760, %v3924_v18 }
 0x12a   : > { %1603 = vmatprep.subr.mxu1 %v4852_v53  ;;  %1472 = vmatpush2.msra.mxu0 %v3977_v42  ;;  %v4856_v42 = vand.u32 4294901760, %v3147_v9  ;;  %v4862_v9 = vand.u32 4294901760, %v3183_v27  ;;  %v4868_v27 = vand.u32 4294901760, %v3246_v58  ;;  %v4877_v58 = vand.u32 4294901760, %v3347_v36  ;;  %v4891_v36 = vld [vmem:[#allocation24_spill] sm:$0xff] }
 0x12b   : > { %1475 = vmatprep.mubr.f32.mxu0 %v3912_v5  ;;  %1605 = vmatpush2.msra.mxu1 %v4853_v28  ;;  %v4857_v28 = vld [vmem:[#allocation98_spill] sm:$0xff] }
 0x12c   : > { %1273 = vmatprep.mubr.f32.mxu1 %v4063_v25  ;;  %1478 = vmatmul.mubr.f32.vlgmr.msra.gmra.mxu0 %v3924_v18  ;;  %v4858_v25 = vld [vmem:[#allocation100_spill] sm:$0xff] }
 0x12d   : > { %1607 = vmatprep.subr.mxu1 %v3791_v35  ;;  %1650 = vmatprep.subr.mxu0 %v4854_v47  ;;  %v4859_v35 = vand.u32 4294901760, %v3161_v17  ;;  %v4864_v17 = vand.u32 4294901760, %v3912_v5  ;;  %v4871_v5 = vand.u32 4294901760, %v3269_v39  ;;  %v4885_v39 = vld [vmem:[#allocation22_spill] sm:$0xff] }
 0x12e   : > { %1275 = vmatmul.mubr.f32.gmra.mxu1 %v4069_v2  ;;  %1654 = vmatpush1.msra.mxu0 %v4855_v19  ;;  %v4863_v19 = vand.u32 4294901760, %v3197_v32  ;;  %v4869_v32 = vand.u32 4294901760, %v3257_v34  ;;  %v4897_v47 = vld [vmem:[#allocation26_spill] sm:$0xff] }
 0x12f   : > { %1609 = vmatpush2.msra.mxu1 %v3802_v24  ;;  %1658 = vmatprep.subr.mxu0 %v4856_v42  ;;  %v4867_v42 = vand.u32 4294901760, %v3235_v50  ;;  %v4873_v50 = vand.u32 4294901760, %v3283_v48  ;;  %v4888_v48 = vld [vmem:[#allocation23_spill] sm:$0xff] }
 0x130   : > { %1611 = vmatprep.subr.mxu1 %v4857_v28  ;;  %1485 = vmatprep.mubr.f32.mxu0 %v4076_v31 }
 0x131   : > { %1613 = vmatpush2.msra.mxu1 %v4858_v25  ;;  %1662 = vmatpush1.msra.mxu0 %v4859_v35  ;;  %v4865_v35 = vand.u32 4294901760, %v3223_v45  ;;  %v4870_v45 = vand.u32 4294901760, %v4076_v31 }
 0x132   : > { %1488 = vmatmul.mubr.f32.gmra.mxu0 %v4083_v54  ;;  %1615 = vmatprep.subr.mxu1 %v4860_v63 }
 0x133   : > { %1666 = vmatprep.subr.mxu0 %v4861_v7  ;;  %1617 = vmatpush2.msra.mxu1 %v3857_v22  ;;  %v4898_v7 = vld [vmem:[#allocation50_spill] sm:$0xff] }
 0x134   : > { %1670 = vmatpush1.msra.mxu0 %v4862_v9  ;;  %1619 = vmatprep.subr.mxu1 %v3870_v20  ;;  %v4899_v9 = vand.u32 4294901760, %v4898_v7 }
 0x135   : > { %1674 = vmatprep.subr.mxu0 %v4863_v19  ;;  %1621 = vmatpush2.msra.mxu1 %v3888_v57  ;;  %v4900_v19 = vld [vmem:[#allocation27_spill] sm:$0xff] }
 0x136   : > { %1625 = vmatprep.mubr.f32.mxu1 %v4864_v17  ;;  %1678 = vmatpush1.msra.mxu0 %v4865_v35  ;;  %v4901_v17 = vld [vmem:[#allocation52_spill] sm:$0xff] }
 0x137   : > { %1629 = vmatmul.mubr.f32.vlgmr.msra.gmra.mxu1 %v4866_v21  ;;  %1682 = vmatprep.subr.mxu0 %v4867_v42  ;;  %v4902_v35 = vand.u32 4294901760, %v4901_v17  ;;  %v4903_v21 = vld [vmem:[#allocation28_spill] sm:$0xff]  ;;  %v4904_v42 = vld [vmem:[#allocation54_spill] sm:$0xff] }
 0x138   : > { %1921 = vmatprep.subr.mxu1 %v3108_v51  ;;  %1686 = vmatpush1.msra.mxu0 %v4868_v27  ;;  %v4872_v51 = vand.u32 4294901760, %v4083_v54  ;;  %v4895_v54 = vld [vmem:[#allocation48_spill] sm:$0xff]  ;;  %v4905_v27 = vand.u32 4294901760, %v4904_v42 }
 0x139   : > { %1923 = vmatpush1.msra.mxu1 %v3110_v52  ;;  %1690 = vmatprep.subr.mxu0 %v4869_v32  ;;  %v4874_v52 = vand.u32 4294901760, %v3295_v30  ;;  %v4882_v30 = vld [vmem:[#allocation21_spill] sm:$0xff]  ;;  %v4896_v31 = vand.u32 4294901760, %v4895_v54 }
 0x13a   : > { %1925 = vmatprep.subr.mxu1 %v3112_v15  ;;  %1637 = vmatprep.mubr.f32.mxu1 %v4870_v45  ;;  %v4875_v15 = vand.u32 4294901760, %v3316_v44  ;;  %v4906_v32 = vld [vmem:[#allocation29_spill] sm:$0xff]  ;;  %v4907_v45 = vld [vmem:[#allocation56_spill] sm:$0xff] }
 0x13b   : > { %1694 = vmatpush1.msra.mxu0 %v4871_v5  ;;  %1927 = vmatpush1.msra.mxu1 %v3114_v55  ;;  %v4876_v55 = vand.u32 4294901760, %v3329_v0  ;;  %v4908_v5 = vand.u32 4294901760, %v4907_v45 }
 0x13c   : > { %1641 = vmatmul.mubr.f32.gmra.mxu1 %v4872_v51  ;;  %1698 = vmatprep.subr.mxu0 %v4873_v50  ;;  %v4909_v51 = vld [vmem:[#allocation30_spill] sm:$0xff] }
 0x13d   : > { %1929 = vmatprep.subr.mxu1 %v3116_v23  ;;  %1702 = vmatpush1.msra.mxu0 %v4874_v52  ;;  %v4878_v23 = vand.u32 4294901760, %v3360_v49  ;;  %v4892_v49 = vld [vmem:[#allocation46_spill] sm:$0xff] }
 0x13e   : > { %1931 = vmatpush1.msra.mxu1 %v3118_v56  ;;  %1706 = vmatprep.subr.mxu0 %v4875_v15  ;;  %v4879_v56 = vand.u32 4294901760, %v3372_v46  ;;  %v4893_v18 = vand.u32 4294901760, %v4892_v49  ;;  %v4910_v50 = vld [vmem:[#allocation58_spill] sm:$0xff]  ;;  %v4912_v15 = vld [vmem:[#allocation31_spill] sm:$0xff] }
 0x13f   : > { %1933 = vmatprep.subr.mxu1 %v3121_v60  ;;  %1710 = vmatpush1.msra.mxu0 %v4876_v55  ;;  %v4880_v60 = vld [vmem:[#allocation38_spill] sm:$0xff]  ;;  %v4911_v52 = vand.u32 4294901760, %v4910_v50  ;;  %v4913_v55 = vld [vmem:[#allocation60_spill] sm:$0xff] }
 0x140   : > { %1935 = vmatpush1.msra.mxu1 %v3123_v61  ;;  %1714 = vmatprep.subr.mxu0 %v4877_v58  ;;  %v4881_v0 = vand.u32 4294901760, %v4880_v60  ;;  %v4883_v61 = vld [vmem:[#allocation40_spill] sm:$0xff]  ;;  %v4914_v58 = vand.u32 4294901760, %v4913_v55 }
 0x141   : > { %1937 = vmatprep.subr.mxu1 %v3125_v62  ;;  %1718 = vmatpush1.msra.mxu0 %v4878_v23  ;;  %v4884_v34 = vand.u32 4294901760, %v4883_v61  ;;  %v4886_v62 = vld [vmem:[#allocation42_spill] sm:$0xff]  ;;  %v4915_v23 = vld [vmem:[#allocation32_spill] sm:$0xff] }
 0x142   : > { %1939 = vmatpush1.msra.mxu1 %v3138_v6  ;;  %1722 = vmatprep.subr.mxu0 %v4879_v56  ;;  %v4887_v44 = vand.u32 4294901760, %v4886_v62  ;;  %v4889_v6 = vld [vmem:[#allocation44_spill] sm:$0xff]  ;;  %v4916_v56 = vld [vmem:[#allocation62_spill] sm:$0xff] }
 0x143   : > { %1941 = vmatprep.subr.mxu1 %v4774_v8  ;;  %1726 = vmatpush1.msra.mxu0 %v4881_v0  ;;  %v4890_v46 = vand.u32 4294901760, %v4889_v6  ;;  %v4894_v8 = vld [vmem:[#allocation25_spill] sm:$0xff]  ;;  %v4917_v60 = vand.u32 4294901760, %v4916_v56 }
 0x144   : > { %1943 = vmatpush1.msra.mxu1 %v4882_v30  ;;  %1730 = vmatprep.subr.mxu0 %v4884_v34  ;;  %v4918_v0 = vld [vmem:[#allocation33_spill] sm:$0xff]  ;;  %v4919_v30 = vld [vmem:[#allocation64_spill] sm:$0xff]  ;;  %v4921_v34 = vld [vmem:[#allocation34_spill] sm:$0xff] }
 0x145   : > { %1945 = vmatprep.subr.mxu1 %v4885_v39  ;;  %1734 = vmatpush1.msra.mxu0 %v4887_v44  ;;  %v4920_v61 = vand.u32 4294901760, %v4919_v30  ;;  %v4922_v39 = vld [vmem:[#allocation66_spill] sm:$0xff]  ;;  %v4924_v44 = vld [vmem:[#allocation35_spill] sm:$0xff] }
 0x146   : > { %1947 = vmatpush1.msra.mxu1 %v4888_v48  ;;  %1738 = vmatprep.subr.mxu0 %v4890_v46  ;;  %v4923_v62 = vand.u32 4294901760, %v4922_v39  ;;  %v4925_v48 = vld [vmem:[#allocation68_spill] sm:$0xff] }
 0x147   : > { %1949 = vmatprep.subr.mxu1 %v4891_v36  ;;  %1742 = vmatpush1.msra.mxu0 %v4893_v18  ;;  %v4926_v6 = vand.u32 4294901760, %v4925_v48  ;;  %v4927_v46 = vld [vmem:[#allocation36_spill] sm:$0xff]  ;;  %v4928_v36 = vld [vmem:[#allocation70_spill] sm:$0xff]  ;;  %v4930_v18 = vld [vmem:[#allocation37_spill] sm:$0xff] }
 0x148   : > { %1951 = vmatpush1.msra.mxu1 %v4894_v8  ;;  %1746 = vmatprep.subr.mxu0 %v4896_v31  ;;  %v4929_v49 = vand.u32 4294901760, %v4928_v36  ;;  %v4931_v8 = vld [vmem:[#allocation72_spill] sm:$0xff]  ;;  %v4933_v31 = vld [vmem:[#allocation39_spill] sm:$0xff]  ;;  %v4965_v36 = vld [vmem:[#allocation61_spill] sm:$0xff] }
 0x149   : > { %1953 = vmatprep.subr.mxu1 %v4897_v47  ;;  %1750 = vmatpush1.msra.mxu0 %v4899_v9  ;;  %v4932_v54 = vand.u32 4294901760, %v4931_v8  ;;  %v4934_v47 = vld [vmem:[#allocation74_spill] sm:$0xff]  ;;  %v4936_v9 = vld [vmem:[#allocation41_spill] sm:$0xff]  ;;  %v4968_v8 = vld [vmem:[#allocation63_spill] sm:$0xff] }
 0x14a   : > { %1955 = vmatpush1.msra.mxu1 %v4900_v19  ;;  %1754 = vmatprep.subr.mxu0 %v4902_v35  ;;  %v4935_v7 = vand.u32 4294901760, %v4934_v47  ;;  %v4937_v19 = vld [vmem:[#allocation76_spill] sm:$0xff]  ;;  %v4939_v35 = vld [vmem:[#allocation43_spill] sm:$0xff] }
 0x14b   : > { %1957 = vmatprep.subr.mxu1 %v4903_v21  ;;  %1758 = vmatpush1.msra.mxu0 %v4905_v27  ;;  %v4938_v17 = vand.u32 4294901760, %v4937_v19  ;;  %v4940_v21 = vld [vmem:[#allocation78_spill] sm:$0xff]  ;;  %v4942_v27 = vld [vmem:[#allocation45_spill] sm:$0xff]  ;;  %v4971_v47 = vld [vmem:[#allocation99_spill] sm:$0xff] }
 0x14c   : > { %1959 = vmatpush1.msra.mxu1 %v4906_v32  ;;  %1762 = vmatprep.subr.mxu0 %v4908_v5  ;;  %v4941_v42 = vand.u32 4294901760, %v4940_v21  ;;  %v4943_v32 = vld [vmem:[#allocation80_spill] sm:$0xff]  ;;  %v4945_v5 = vld [vmem:[#allocation47_spill] sm:$0xff]  ;;  %v4975_v19 = vld [vmem:[#allocation69_spill] sm:$0xff] }
 0x14d   : > { %1961 = vmatprep.subr.mxu1 %v4909_v51  ;;  %1766 = vmatpush1.msra.mxu0 %v4911_v52  ;;  %v4944_v45 = vand.u32 4294901760, %v4943_v32  ;;  %v4946_v51 = vld [vmem:[#allocation82_spill] sm:$0xff]  ;;  %v4948_v52 = vld [vmem:[#allocation49_spill] sm:$0xff]  ;;  %v4978_v21 = vld [vmem:[#allocation71_spill] sm:$0xff] }
 0x14e   : > { %1963 = vmatpush1.msra.mxu1 %v4912_v15  ;;  %1770 = vmatprep.subr.mxu0 %v4914_v58  ;;  %v4947_v50 = vand.u32 4294901760, %v4946_v51  ;;  %v4949_v15 = vld [vmem:[#allocation84_spill] sm:$0xff]  ;;  %v4951_v58 = vld [vmem:[#allocation51_spill] sm:$0xff] }
 0x14f   : > { %1965 = vmatprep.subr.mxu1 %v4915_v23  ;;  %1774 = vmatpush1.msra.mxu0 %v4917_v60  ;;  %v4950_v55 = vand.u32 4294901760, %v4949_v15  ;;  %v4952_v23 = vld [vmem:[#allocation86_spill] sm:$0xff]  ;;  %v4954_v60 = vld [vmem:[#allocation53_spill] sm:$0xff] }
 0x150   : > { %1967 = vmatpush1.msra.mxu1 %v4918_v0  ;;  %1778 = vmatprep.subr.mxu0 %v4920_v61  ;;  %v4953_v56 = vand.u32 4294901760, %v4952_v23  ;;  %v4955_v0 = vld [vmem:[#allocation88_spill] sm:$0xff]  ;;  %v4957_v61 = vld [vmem:[#allocation55_spill] sm:$0xff]  ;;  %v5000_v23 = vlaneseq }
 0x151   : > { %1969 = vmatprep.subr.mxu1 %v4921_v34  ;;  %1782 = vmatpush2.msra.mxu0 %v4923_v62  ;;  %v4956_v30 = vand.u32 4294901760, %v4955_v0  ;;  %v4958_v34 = vld [vmem:[#allocation90_spill] sm:$0xff]  ;;  %v4960_v62 = vld [vmem:[#allocation57_spill] sm:$0xff] }
 0x152   : > { %1971 = vmatpush1.msra.mxu1 %v4924_v44  ;;  %1786 = vmatprep.subr.mxu0 %v4926_v6  ;;  %v4959_v39 = vand.u32 4294901760, %v4958_v34  ;;  %v4961_v44 = vld [vmem:[#allocation92_spill] sm:$0xff]  ;;  %v4963_v6 = vld [vmem:[#allocation94_spill] sm:$0xff] }
 0x153   : > { %1973 = vmatprep.subr.mxu1 %v4927_v46  ;;  %1790 = vmatpush2.msra.mxu0 %v4929_v49  ;;  %v4962_v48 = vand.u32 4294901760, %v4961_v44  ;;  %v4964_v46 = vand.u32 4294901760, %v4963_v6  ;;  %v4966_v49 = vld [vmem:[#allocation96_spill] sm:$0xff]  ;;  %v2065_v44 = vld [vmem:[#allocation4] sm:$0x3] }
 0x154   : > { %1975 = vmatpush1.msra.mxu1 %v4930_v18  ;;  %1794 = vmatprep.subr.mxu0 %v4932_v54  ;;  %v4967_v18 = vand.u32 4294901760, %v4966_v49  ;;  %v4969_v54 = vand.u32 4294901760, %v4836_v43 }
 0x155   : > { %1977 = vmatprep.subr.mxu1 %v4933_v31  ;;  %1798 = vmatpush2.msra.mxu0 %v4935_v7  ;;  %v4970_v31 = vld [vmem:[#allocation65_spill] sm:$0xff]  ;;  %v4972_v7 = vand.u32 4294901760, %v4971_v47 }
 0x156   : > { %1979 = vmatpush1.msra.mxu1 %v4936_v9  ;;  %1802 = vmatprep.subr.mxu0 %v4938_v17  ;;  %v4976_v17 = vld [vmem:[#allocation103_spill] sm:$0xff] }
 0x157   : > { %1981 = vmatprep.subr.mxu1 %v4939_v35  ;;  %1806 = vmatpush2.msra.mxu0 %v4941_v42  ;;  %v4977_v35 = vand.u32 4294901760, %v4976_v17  ;;  %v4979_v42 = vld [vmem:[#allocation104_spill] sm:$0xff] }
 0x158   : > { %1983 = vmatpush1.msra.mxu1 %v4942_v27  ;;  %1810 = vmatprep.subr.mxu0 %v4944_v45  ;;  %v4980_v43 = vand.u32 4294901760, %v4979_v42  ;;  %v4981_v27 = vand.u32 4294901760, %v3880_v33  ;;  %v4984_v45 = vand.u32 4294901760, %v3904_v3  ;;  %v4987_v33 = vand.u32 4294901760, %v3928_v14 }
 0x159   : > { %1985 = vmatprep.subr.mxu1 %v4945_v5  ;;  %1814 = vmatpush2.msra.mxu0 %v4947_v50  ;;  %v4985_v5 = vld [vmem:[#allocation108_spill] sm:$0xff]  ;;  %v4989_v3 = vand.u32 4294901760, %v3951_v16  ;;  %v4997_v16 = vld [vmem:[#allocation107_spill] sm:$0xff] }
 0x15a   : > { %1987 = vmatpush2.msra.mxu1 %v4948_v52  ;;  %1818 = vmatprep.subr.mxu0 %v4950_v55  ;;  %v4986_v51 = vand.u32 4294901760, %v4985_v5 }
 0x15b   : > { %1989 = vmatprep.subr.mxu1 %v4951_v58  ;;  %1822 = vmatpush2.msra.mxu0 %v4953_v56  ;;  %v2070_v56 = vshrl.u32 %v5000_v23, 7 }
 0x15c   : > { %1991 = vmatpush2.msra.mxu1 %v4954_v60  ;;  %1826 = vmatprep.subr.mxu0 %v4956_v30 }
 0x15d   : > { %1993 = vmatprep.subr.mxu1 %v4957_v61  ;;  %1830 = vmatpush2.msra.mxu0 %v4959_v39  ;;  %v2075_v61 = vsub.s32 0, %v2070_v56 }
 0x15e   : > { %1995 = vmatpush2.msra.mxu1 %v4960_v62  ;;  %1834 = vmatprep.subr.mxu0 %v4962_v48 }
 0x15f   : > { %1997 = vmatprep.subr.mxu1 %v4831_v13  ;;  %1838 = vmatpush2.msra.mxu0 %v4964_v46  ;;  %v4973_v13 = vld [vmem:[#allocation101_spill] sm:$0xff]  ;;  %v2079_v46 = vsub.s32 1, %v2070_v56 }
 0x160   : > { %1999 = vmatpush2.msra.mxu1 %v4965_v36  ;;  %1842 = vmatprep.subr.mxu0 %v4967_v18  ;;  %v4974_v9 = vand.u32 4294901760, %v4973_v13 }
 0x161   : > { %2001 = vmatprep.subr.mxu1 %v4968_v8  ;;  %1846 = vmatpush2.msra.mxu0 %v4969_v54  ;;  %v2076_v54 = vrot.slane %v2065_v44, %v2075_v61 }
 0x162   : > { %2003 = vmatpush2.msra.mxu1 %v4970_v31  ;;  %1850 = vmatprep.subr.mxu0 %v4972_v7  ;;  %v2071_v31 = vadd.s32 8, %v2070_v56 }
 0x163   : > { %2005 = vmatprep.subr.mxu1 %v4839_v29  ;;  %1854 = vmatpush2.msra.mxu0 %v4974_v9  ;;  %v4982_v29 = vld [vmem:[#allocation105_spill] sm:$0xff]  ;;  %vm2081_vm5 = vcmp.eq.s32.totalorder %v2070_v56, %v2076_v54 }
 0x164   : > { %2007 = vmatpush2.msra.mxu1 %v4975_v19  ;;  %1858 = vmatprep.subr.mxu0 %v4977_v35  ;;  %v4983_v32 = vand.u32 4294901760, %v4982_v29  ;;  %v2080_v35 = vrot.slane %v2065_v44, %v2079_v46  ;;  %vm2083_vm6 = vcmp.eq.s32.totalorder %v2071_v31, %v2076_v54 }
 0x165   : > { %2009 = vmatprep.subr.mxu1 %v4978_v21  ;;  %1862 = vmatpush2.msra.mxu0 %v4980_v43 }
 0x166   : > { %2011 = vmatpush2.msra.mxu1 %v4843_v40  ;;  %1866 = vmatprep.subr.mxu0 %v4981_v27  ;;  %v4993_v40 = vld [vmem:[#allocation110_spill] sm:$0xff]  ;;  %vm2082_vm7 = vcmp.eq.s32.totalorder %v2070_v56, %v2080_v35  ;;  %vm2084_vm8 = vcmp.eq.s32.totalorder %v2071_v31, %v2080_v35 }
 0x167   : > { %2013 = vmatprep.subr.mxu1 %v4844_v37  ;;  %1870 = vmatpush2.msra.mxu0 %v4983_v32  ;;  %v4988_v37 = vand.u32 4294901760, %v3935_v59  ;;  %v4994_v59 = vand.u32 4294901760, %v4993_v40 }
 0x168   : > { %2015 = vmatpush2.msra.mxu1 %v4845_v26  ;;  %1874 = vmatprep.subr.mxu0 %v4984_v45  ;;  %v4995_v26 = vld [vmem:[#allocation106_spill] sm:$0xff] }
 0x169   : > { %2017 = vmatprep.subr.mxu1 %v4846_v12  ;;  %1878 = vmatpush2.msra.mxu0 %v4986_v51  ;;  %v4990_v12 = vand.u32 4294901760, %v3961_v10  ;;  %v4999_v10 = vld [vmem:[#allocation20_spill] sm:$0xff] }
 0x16a   : > { %2019 = vmatpush2.msra.mxu1 %v4847_v38  ;;  %1882 = vmatprep.subr.mxu0 %v4987_v33  ;;  %v4991_v38 = vld [vmem:[#allocation109_spill] sm:$0xff] }
 0x16b   : > { %2021 = vmatprep.subr.mxu1 %v4848_v1  ;;  %1886 = vmatpush2.msra.mxu0 %v4988_v37  ;;  %v4992_v14 = vand.u32 4294901760, %v4991_v38  ;;  %v4998_v1 = vld [vmem:[#allocation95_spill] sm:$0xff] }
 0x16c   : > { %2023 = vmatpush2.msra.mxu1 %v4849_v4  ;;  %1890 = vmatprep.subr.mxu0 %v4989_v3  ;;  %v4996_v4 = vld [vmem:[#allocation93_spill] sm:$0xff] }
 0x16d   : > { %2025 = vmatprep.subr.mxu1 %v4850_v41  ;;  %1894 = vmatpush2.msra.mxu0 %v4990_v12 }
 0x16e   : > { %2027 = vmatpush2.msra.mxu1 %v4851_v11  ;;  %1898 = vmatprep.subr.mxu0 %v4992_v14 }
 0x16f   : > { %2029 = vmatprep.subr.mxu1 %v4852_v53  ;;  %1902 = vmatpush2.msra.mxu0 %v4994_v59 }
 0x170   : > { %1904 = vmatprep.mubr.f32.mxu0 %v4995_v26  ;;  %2031 = vmatpush2.msra.mxu1 %v4996_v4 }
 0x171   : > { %1906 = vmatmul.mubr.f32.vlgmr.msra.gmra.mxu0 %v4997_v16  ;;  %2033 = vmatprep.subr.mxu1 %v4998_v1 }
 0x172   : > { %2035 = vmatpush2.msra.mxu1 %v3802_v24  ;;  %1912 = vmatprep.mubr.f32.mxu0 %v4999_v10 }
 0x173   : > { %2037 = vmatprep.subr.mxu1 %v4857_v28  ;;  %2049 = vmatprep.mubr.f32.mxu1 %v4995_v26 }
 0x174   : > { %2039 = vmatpush2.msra.mxu1 %v4858_v25 }
 0x175   : > { %1914 = vmatmul.mubr.f32.gmra.mxu0 %v4069_v2  ;;  %2041 = vmatprep.subr.mxu1 %v4860_v63 }
 0x176   : > { %2043 = vmatpush2.msra.mxu1 %v3857_v22 }
 0x177   : > { %2045 = vmatprep.subr.mxu1 %v3870_v20 }
 0x178   : > { %2047 = vmatpush2.msra.mxu1 %v3888_v57 }
 0x179   : > { %2051 = vmatmul.mubr.f32.vlgmr.msra.gmra.mxu1 %v4997_v16 }
 0x17a   : > { %2057 = vmatprep.mubr.f32.mxu1 %v4999_v10  ;;  %v2721_v10 = vmov 1966171168  }
 0x17d   : > { %2059 = vmatmul.mubr.f32.gmra.mxu1 %v4069_v2 }
 0x1aa   : > { %v859_v24 = vpop.f32.mrf.mxu0 }
 0x1ac   : > { %v861_v11 = vpop.f32.mrf.mxu0 }
 0x1b2   : > { %v1268_v25 = vpop.f32.mrf.mxu1 }
 0x1b3   : > { %v1269_v2 = vadd.f32 %v1268_v25, %v859_v24  ;;  %v2107_v24 = vunpack.c.l.s4 %v2721_v10 }
 0x1b4   : > { %v1270_v28 = vpop.f32.mrf.mxu1 }
 0x1b5   : > { %v1271_v34 = vadd.f32 %v1270_v28, %v861_v11  ;;  %v2108_v28 = vunpack.c.0.s8 %v2107_v24 }
 0x1e7   : > { %v875_v41 = vpop.f32.mrf.mxu0 }
 0x1e9   : > { %v877_v53 = vpop.f32.mrf.mxu0 }
 0x1ec   : > { %v1479_v50 = vpop.f32.mrf.mxu0 }
 0x1ed   : > { %v1480_v39 = vadd.f32 %v1479_v50, %v1269_v2 }
 0x1ee   : > { %v1276_v63 = vpop.f32.mrf.mxu1  ;;  %v1481_v52 = vpop.f32.mrf.mxu0 }
 0x1ef   : > { %v1277_v30 = vadd.f32 %v1276_v63, %v875_v41  ;;  %v1482_v36 = vadd.f32 %v1481_v52, %v1271_v34 }
 0x1f0   : > { %v1278_v22 = vpop.f32.mrf.mxu1 }
 0x1f1   : > { %v1279_v62 = vadd.f32 %v1278_v22, %v877_v53  ;;  %v2111_v22 = vsub.s32 %v2108_v28, %v2070_v56 }
 0x1f2   : > { %v1489_v15 = vpop.f32.mrf.mxu0 }
 0x1f3   : > { %v1490_v49 = vadd.f32 %v1489_v15, %v1277_v30 }
 0x1f4   : > { %v1491_v55 = vpop.f32.mrf.mxu0 }
 0x1f5   : > { %v1492_v47 = vadd.f32 %v1491_v55, %v1279_v62  ;;  %v2072_v55 = vld [vmem:[#allocation2] sm:$0x3] }
 0x1f7   : > { %v1630_v20 = vpop.f32.mrf.mxu1 }
 0x1f8   : > { %v1631_v18 = vadd.f32 %v1630_v20, %v1480_v39 }
 0x1f9   : > { %v1632_v57 = vpop.f32.mrf.mxu1 }
 0x1fa   : > { %v1633_v7 = vadd.f32 %v1632_v57, %v1482_v36 }
 0x1fc   : > { %v1642_v60 = vpop.f32.mrf.mxu1 }
 0x1fd   : > { %v1643_v13 = vadd.f32 %v1642_v60, %v1490_v49 }
 0x1fe   : > { %v1644_v48 = vpop.f32.mrf.mxu1 }
 0x1ff   : > { %v1645_v21 = vadd.f32 %v1644_v48, %v1492_v47 }
 0x231   : > { %v1907_v58 = vpop.f32.mrf.mxu0 }
 0x232   : > { %v1908_v9 = vadd.f32 %v1907_v58, %v1631_v18 }
 0x233   : > { %v1909_v0 = vpop.f32.mrf.mxu0 }
 0x234   : > { %v1910_v42 = vadd.f32 %v1909_v0, %v1633_v7 }
 0x235   : > { %v1915_v6 = vpop.f32.mrf.mxu0 }
 0x236   : > { %v1916_v43 = vadd.f32 %v1915_v6, %v1643_v13 }
 0x237   : > { %v1917_v19 = vpop.f32.mrf.mxu0 }
 0x238   : > { %v1918_v32 = vadd.f32 %v1917_v19, %v1645_v21 }
 0x239   : > { %v2052_v8 = vpop.f32.mrf.mxu1 }
 0x23a   : > { %v2053_v27 = vadd.f32 %v2052_v8, %v1908_v9 }
 0x23b   : > { %v2054_v17 = vpop.f32.mrf.mxu1 }
 0x23c   : > { %v2055_v45 = vadd.f32 %v2054_v17, %v1910_v42  ;;  %v2085_v33 = vsel %vm2081_vm5, %v2053_v27, 0.0 }
 0x23d   : > { %v2060_v29 = vpop.f32.mrf.mxu1 }
 0x23e   : > { %v2061_v5 = vadd.f32 %v2060_v29, %v1916_v43  ;;  %v2086_v38 = vsel %vm2082_vm7, %v2055_v45, 0.0 }
 0x23f   : > { %v2062_v51 = vpop.f32.mrf.mxu1 }
 0x240   : > { %v2087_v37 = vsel %vm2083_vm6, %v2061_v5, 0.0  ;;  %v2063_v3 = vadd.f32 %v2062_v51, %v1918_v32 }
 0x241   : > { %v2089_v12 = vadd.f32 %v2087_v37, %v2085_v33 }
 0x242   : > { %v2088_v14 = vsel %vm2084_vm8, %v2063_v3, 0.0 }
 0x243   : > { %v2090_v40 = vrot.slane %v2089_v12, 4  ;;  %v2096_v59 = vadd.f32 %v2088_v14, %v2086_v38 }
 0x245   : > { %v2091_v26 = vadd.f32 %v2090_v40, %v2089_v12  ;;  %v2097_v4 = vrot.slane %v2096_v59, 4 }
 0x247   : > { %v2092_v16 = vrot.slane %v2091_v26, 2  ;;  %v2098_v1 = vadd.f32 %v2097_v4, %v2096_v59 }
 0x249   : > { %v2093_v11 = vadd.f32 %v2092_v16, %v2091_v26  ;;  %v2099_v41 = vrot.slane %v2098_v1, 2 }
 0x24b   : > { %v2094_v25 = vrot.slane %v2093_v11, 1  ;;  %v2100_v53 = vadd.f32 %v2099_v41, %v2098_v1 }
 0x24d   : > { %v2101_v50 = vrot.slane %v2100_v53, 1  ;;  %v2095_v63 = vadd.f32 %v2094_v25, %v2093_v11 }
 0x24f   : > { %v2102_v52 = vadd.f32 %v2101_v50, %v2100_v53 }
 0x251   : > { %v2105_v15 = vcombine.low %v2095_v63, %v2102_v52 }
 0x253   : > { %v2112_v20 = vrot.slane %v2105_v15, %v2111_v22 }
 0x255   : > { %v2119_v57 = vrot.slane %v2112_v20, %v2111_v22 }
 0x257   : > { %v2121_v58 = vadd.f32 %v2119_v57, %v2072_v55 }
 0x259   : > { %2126 = vst.msk [vmem:[#allocation2] sm:$0x3] %vm2905_vm0, %v2121_v58 }
 0x25a PF: > { %v2131_v39 = vld [vmem:[%s2918_s27] sm:$0x3]  ;;  %v5002_v18 = vlaneseq  ;;  %v2132_v54 = vld [vmem:[%s2915_s28] sm:$0x3]  ;;  %vm2162_vm9 = vcmask 1040384   ;;  %s2436_s18 = sshll.u32 %s2703_s24, 4 }
 0x25b   : > { %v2175_v47 = vmul.f32 %v2132_v54, %v2131_v39  ;;  %s2220_s16 = sshll.u32 %s322_s29, 4  ;;  %s4368_s6 = scalar_lea.hbm %s4416_s5, %s2436_s18  ;;  %s2221_s16 = int_to_ptr.vmem [resolvable:$true] %s2220_s16 }
 0x25c   : > { %v2153_v8 = vshrl.u32 %v5002_v18, 7  ;;  %s2208_s30 = scalar_lea.sflag [#allocation9], %s2884_s11  ;;  %s2625_s12 = scalar_lea.vmem %s2221_s16, 16 }
 0x25d   : > { %p2626_p1 = scmp.ne.s32.totalorder %s2221_s16, %s2625_s12  ;;  %s2722_s24 = smov [#allocation13]  }
 0x25e   : > { %v2154_v9 = vsub.s32 0, %v2153_v8  ;;  %v2158_v19 = vsub.s32 1, %v2153_v8  ;;  %s2629_s26 = sshll.u32 %s2722_s24, 4  ;;  %s2630_s26 = int_to_ptr.vmem [resolvable:$false] %s2629_s26 }
 0x25f   : > { %p2627_p10 = pnand %p2626_p1, %p2811_p9  ;;  %s2631_s19 = scalar_lea.vmem %s2630_s26, 32 }
 0x260   : > { %v2130_v60 = vld [vmem:[#allocation2] sm:$0x3]  ;;  %v2180_v35 = vrot.slane %v2175_v47, %v2154_v9  ;;  %v2184_v21 = vrot.slane %v2175_v47, %v2158_v19  ;;  %p2632_p2 = scmp.lt.s32.totalorder %s2221_s16, %s2630_s26  ;;  %p2633_p3 = scmp.lt.s32.totalorder %s2631_s19, %s2625_s12 }
 0x261   : > { %v2136_v0 = vand.u32 2147483647, %v2130_v60  ;;  %v2133_v44 = vmax.f32 %v2130_v60, 0.0  ;;  %v2134_v48 = vmul.f32 %v2131_v39, %v2130_v60  ;;  %p2628_p12 = pneg %p2627_p10 }
 0x262   : > { %v2187_v32 = vsel %vm2162_vm9, %v2180_v35, 0.0  ;;  %v2188_v45 = vsel %vm2162_vm9, %v2184_v21, 0.0  ;;  %p2634_p4 = por %p2633_p3, %p2632_p2 }
 0x263   : > { %v2137_v2 = vsub.f32 0.0, %v2136_v0  ;;  %v2135_v49 = vsub.f32 %v2133_v44, %v2134_v48  ;;  %v2189_v51 = vadd.f32 %v2188_v45, %v2187_v32 }
 0x264   : > { %p2635_p5 = pnand %p2634_p4, %p2628_p12 }
 0x265   : > { %v2138_v30 = vmul.f32 1.442695, %v2137_v2 }
 0x267   : > { %2527 = vpow2.f32 %v2138_v30 }
 0x274   : > { %v2528_v61 = vpop.eup %2527 }
 0x275   : > { %v2140_v34 = vadd.f32 1.0, %v2528_v61  ;;  %v2143_v56 = vmul.f32 -0.5, %v2528_v61  ;;  %v2146_v6 = vand.u32 2147483647, %v2528_v61 }
 0x277   : > { %2529 = vlog2.f32 %v2140_v34  ;;  %v2144_v62 = vadd.f32 1.0, %v2143_v56  ;;  %vm2147_vm0 = vcmp.lt.f32.partialorder %v2146_v6, 0.0004427343 }
 0x279   : > { %v2145_v46 = vmul.f32 %v2528_v61, %v2144_v62 }
 0x284   : > { %v2530_v36 = vpop.eup %2529 }
 0x285   : > { %v2142_v31 = vmul.f32 0.6931472, %v2530_v36 }
 0x287   : > { %v2148_v7 = vsel %vm2147_vm0, %v2145_v46, %v2142_v31 }
 0x288   : > { %v2149_v13 = vadd.f32 %v2148_v7, %v2135_v49 }
 0x28a   : > { %v2150_v17 = vmul.f32 %v2149_v13, %v2132_v54 }
 0x28c   : > { %v2155_v42 = vrot.slane %v2150_v17, %v2154_v9  ;;  %v2159_v43 = vrot.slane %v2150_v17, %v2158_v19 }
 0x28e   : > { %v2163_v27 = vsel %vm2162_vm9, %v2155_v42, 0.0  ;;  %v2164_v29 = vsel %vm2162_vm9, %v2159_v43, 0.0 }
 0x28f   : > { %v2165_v5 = vadd.f32 %v2164_v29, %v2163_v27 }
 0x291   : > { %2166 = vadd.xlane.f32.xlu0 %v2165_v5 }
 0x295   : > { %2190 = vadd.xlane.f32.xlu0 %v2189_v51 }
 0x31a   : > { %v2167_v33 = vpop.xlane.xlu0 %2166 }
 0x31b   : > { %v2168_v37 = vrot.slane %v2167_v33, 4 }
 0x31d   : > { %v2169_v3 = vadd.f32 %v2168_v37, %v2167_v33 }
 0x31e   : > { %v2191_v12 = vpop.xlane.xlu0 %2190 }
 0x31f   : > { %v2170_v38 = vrot.slane %v2169_v3, 2  ;;  %v2192_v14 = vrot.slane %v2191_v12, 4 }
 0x321   : > { %v2193_v40 = vadd.f32 %v2192_v14, %v2191_v12  ;;  %v2171_v59 = vadd.f32 %v2170_v38, %v2169_v3 }
 0x323   : > { %v2194_v26 = vrot.slane %v2193_v40, 2  ;;  %v2172_v4 = vrot.slane %v2171_v59, 1 }
 0x325   : > { %v2195_v16 = vadd.f32 %v2194_v26, %v2193_v40  ;;  %v2173_v1 = vadd.f32 %v2172_v4, %v2171_v59 }
 0x327   : > { %2443 = vpush %v2173_v1  ;;  %v2196_v10 = vrot.slane %v2195_v16, 1 }
 0x329   : > { %v2197_v24 = vadd.f32 %v2196_v10, %v2195_v16 }
 0x32b   : > { %2445 = vpush %v2197_v24 }
 0x358   : > { %s2444_s17 = spop %2443 }
 0x35c   : > { %s2446_s2 = spop %2445 }
 0x35d   : > { %s5012_s2 = smov (!%p338_p8, %s2446_s2), 1.0 }
 0x35e   : > { %v2200_v11 = vstv %s5012_s2 }
 0x35f   : > { %2531 = vrcp.f32 %v2200_v11 }
 0x36c   : > { %v2532_v41 = vpop.eup %2531 }
 0x36d   : > { %2447 = vpush %v2532_v41 }
 0x39e   : > { %s2448_s3 = spop %2447 }
 0x39f   : > { %s2203_s13 = smul.f32 %s2448_s3, %s2444_s17 }
 0x3a1   : > { %s5014_s13 = smov (!%p338_p8, %s2203_s13), 0.0 }
 0x3a2   : > { %v2205_v25 = vstv %s5014_s13 }
 0x3a3   : > { %2206 = vst [vmem:[%s322_s29] sm:$0x1] %v2205_v25 }
 0x3a4   : > { %2638 = shalt.err (!%p2635_p5)
}
 0x3a5   : > { %s2639_s7 = scalar_lea.hbm %s4368_s6, 16  ;;  %s2643_s15 = scalar_lea.hbm %s4416_s5, 48 }
 0x3a6   : > { %p2640_p6 = scmp.ne.s32.totalorder %s4368_s6, %s2639_s7  ;;  %p2644_p8 = scmp.lt.s32.totalorder %s4368_s6, %s4416_s5 }
 0x3a7   : > { %p2645_p0 = scmp.lt.s32.totalorder %s2643_s15, %s2639_s7 }
 0x3a8   : > { %p2641_p7 = pnand %p2640_p6, %p2811_p9 }
 0x3a9   : > { %p2646_p1 = por %p2645_p0, %p2644_p8 }
 0x3aa   : > { %p2642_p13 = pneg %p2641_p7 }
 0x3ac   : > { %p2647_p10 = pnand %p2646_p1, %p2642_p13 }
 0x3ae   : > { %2650 = shalt.err (!%p2647_p10)
}
 0x3af   : > { %2455 = dma.vmem_to_hbm [thread:$0]  (%p2811_p9), %s2221_s16, 16, %s4368_s6, %s2208_s30  }
 0x3b0 PF: > { %p2472_p12 = scmp.ge.s32.totalorder %s2711_s0, 2  ;;  %s2232_s29 = sand.u32 1, %s2691_s21  }
 0x3b1   : > { %s2233_s17 = scalar_lea.sflag [#allocation9], %s2232_s29 }
 0x3b2   : > { %p2468_p2 = pnand %p2472_p12, %p2818_p11 }
 0x3b4   : > { %p2469_p3 = pneg %p2468_p2 }
 0x3b6   : > { %2686 = dma.done.wait (%p2469_p3), %s2233_s17, 16  }
 0x3b7   : > { %2688 = vsyncadd (%p2469_p3), %s2233_s17, 4294967280  ;;  %s28_s0 = sadd.s32 1, %s2711_s0   ;;  %s5003_s8 = sld [smem:[#allocation18_spill]] }
 0x3b8   : > { %p25_p4 = scmp.ge.s32.totalorder %s28_s0, 5   ;;  %s5004_s21 = smov %s2695_s22 }
 0x3b9   : > { %s5005_s22 = smov %s2699_s23  ;;  %s5006_s23 = smov %s2816_s9 }
 0x3ba   : > { %s5007_s24 = smov %s2707_s25  ;;  %27 = sbr.rel (!%p25_p4) target bundleno = 16 (0x10), region = 124 }
 0x3bd   : > { %s5008_s25 = smov %s5003_s8 }
 0x3bf   :  { %2237 = vsyncpa [#allocation8], 1 }
 0x3c0   :  { %2239 = vsyncpa [#allocation8 + $0x1], 1 }
 0x3c1   :  { %2240 = vsyncpa [#allocation11], 1 }
 0x3c2   :  { %2242 = vsyncpa [#allocation11 + $0x1], 1 }
 0x3c3   :  { %2243 = vsyncpa [#allocation9], 1 }
 0x3c4   :  { %2245 = vsyncpa [#allocation9 + $0x1], 1 }

</bundles_post_ra>
